<compile_context>
chip_gen: v6e
topology: v6e:2x2x1
jax: 0.10.0
libtpu: 0.0.40
codegen_flags: <defaults>
</compile_context>

<pallas_src>
import functools

import jax
import jax.numpy as jnp
from jax.experimental import pallas as pl
from jax.experimental.pallas import tpu as pltpu

H1 = 1024
H2 = 512
OUT = 206
OUT_PAD = 256                      # lane-dense padded output width
VMEM_LIMIT_BYTES = 40 * 1024 * 1024


def _round_up(x, m):
    return (x + m - 1) // m * m


def _use_bf16_activations():
    """bf16 VPU/EUP exists on v6e/v7x; keep f32 activations elsewhere."""
    try:
        kind = jax.devices()[0].device_kind.lower()
    except Exception:
        return False
    return ("v6" in kind) or ("v7" in kind)


def moa_kernel(x_ref, w1_ref, b1_ref, w2_ref, b2_ref, w3_ref, b3_ref, o_ref,
               *, act_dtype):
    # x streams in as f32; cast to bf16 in-kernel (VPU has slack) for the MXU.
    x = x_ref[...].astype(jnp.bfloat16)
    # layer 1: bf16 operands, f32 accumulation; bias + tanh in act_dtype
    h1 = jnp.dot(x, w1_ref[...], preferred_element_type=jnp.float32)
    h1 = jnp.tanh((h1 + b1_ref[...]).astype(act_dtype))
    # layer 2
    h2 = jnp.dot(h1.astype(jnp.bfloat16), w2_ref[...],
                 preferred_element_type=jnp.float32)
    h2 = jnp.tanh((h2 + b2_ref[...]).astype(act_dtype))
    # layer 3 + sigmoid (lane-dense padded output), f32
    z3 = jnp.dot(h2.astype(jnp.bfloat16), w3_ref[...],
                 preferred_element_type=jnp.float32)
    o_ref[...] = jax.nn.sigmoid(z3 + b3_ref[...]).astype(o_ref.dtype)


def prepare_params(w1, b1, w2, b2, w3, b3):
    """One-time parameter prep (hoisted out of the per-call path):
    bf16 matmul weights, layer-3 weight/bias padded to OUT_PAD columns."""
    w1b = w1.astype(jnp.bfloat16)
    w2b = w2.astype(jnp.bfloat16)
    w3b = jnp.pad(w3, ((0, 0), (0, OUT_PAD - OUT))).astype(jnp.bfloat16)
    b1r = jnp.asarray(b1, jnp.float32).reshape(1, H1)
    b2r = jnp.asarray(b2, jnp.float32).reshape(1, H2)
    b3p = jnp.pad(jnp.asarray(b3, jnp.float32).reshape(1, OUT),
                  ((0, 0), (0, OUT_PAD - OUT)))
    return w1b, b1r, w2b, b2r, w3b, b3p


@functools.partial(jax.jit, static_argnames=("block_b", "use_bf16_act"))
def moa_forward_prepared(x, w1b, b1, w2b, b2, w3b, b3, *, block_b=512,
                         use_bf16_act=False):
    B, F = x.shape

    # Pad the batch only to a sublane multiple of 8 (not to a full tile).
    B_pad = _round_up(B, 8)
    if B_pad != B:
        x = jnp.pad(x, ((0, B_pad - B), (0, 0)))

    # Tile: at most block_b rows; prefer >= 2 grid steps so the "parallel"
    # grid axis can be split across both TensorCores on v7x.
    bb = min(block_b, max(8, _round_up(pl.cdiv(B_pad, 2), 8)))
    grid = (pl.cdiv(B_pad, bb),)     # last tile may be partial (rows dropped)

    act_dtype = jnp.bfloat16 if use_bf16_act else jnp.float32

    # Weights/biases fully VMEM-resident per grid step (constant index map).
    full = lambda shape: pl.BlockSpec(shape, lambda i: (0, 0))

    flops = 2 * B_pad * (F * H1 + H1 * H2 + H2 * OUT_PAD)
    transcendentals = B_pad * (H1 + H2 + OUT_PAD)
    bytes_accessed = (
        B_pad * F * 4                              # x (f32)
        + (F * H1 + H1 * H2 + H2 * OUT_PAD) * 2    # weights (bf16)
        + (H1 + H2 + OUT_PAD) * 4                  # biases (f32)
        + B_pad * OUT_PAD * 4                      # output (f32)
    )

    out = pl.pallas_call(
        functools.partial(moa_kernel, act_dtype=act_dtype),
        out_shape=jax.ShapeDtypeStruct((B_pad, OUT_PAD), jnp.float32),
        grid_spec=pltpu.PrefetchScalarGridSpec(
            num_scalar_prefetch=0,
            grid=grid,
            in_specs=[
                pl.BlockSpec((bb, F), lambda i: (i, 0)),        # x tile (f32)
                full((F, H1)), full((1, H1)),                   # layer 1
                full((H1, H2)), full((1, H2)),                  # layer 2
                full((H2, OUT_PAD)), full((1, OUT_PAD)),        # layer 3
            ],
            out_specs=pl.BlockSpec((bb, OUT_PAD), lambda i: (i, 0)),
        ),
        compiler_params=pltpu.CompilerParams(
            dimension_semantics=("parallel",),
            vmem_limit_bytes=VMEM_LIMIT_BYTES),
        cost_estimate=pl.CostEstimate(
            flops=flops,
            transcendentals=transcendentals,
            bytes_accessed=bytes_accessed),
    )(x, w1b, b1, w2b, b2, w3b, b3)

    # Strip batch padding and the extra output columns.
    return out[:B, :OUT]


def init_params(key, input_num):
    # Deterministic synthetic init (PyTorch-default-like uniform fan-in bounds).
    ks = jax.random.split(key, 6)

    def lin(kw, kb, fan_in, fan_out):
        bound = 1.0 / jnp.sqrt(fan_in)
        w = jax.random.uniform(kw, (fan_in, fan_out), jnp.float32, -bound, bound)
        b = jax.random.uniform(kb, (1, fan_out), jnp.float32, -bound, bound)
        return w, b

    w1, b1 = lin(ks[0], ks[1], input_num, H1)
    w2, b2 = lin(ks[2], ks[3], H1, H2)
    w3, b3 = lin(ks[4], ks[5], H2, OUT)
    return w1, b1, w2, b2, w3, b3


def reference_forward_f32(x, w1, b1, w2, b2, w3, b3):
    h = jnp.tanh(x @ w1 + b1)
    h = jnp.tanh(h @ w2 + b2)
    return jax.nn.sigmoid(h @ w3 + b3)


def reference_forward_kernel_path(x, w1, b1, w2, b2, w3, b3, use_bf16_act):
    # Mirrors the kernel's exact numerics: bf16 matmul operands with f32
    # accumulation, tanh in act dtype, sigmoid in f32.
    bf = jnp.bfloat16
    act = bf if use_bf16_act else jnp.float32
    h = jnp.dot(x.astype(bf), w1.astype(bf), preferred_element_type=jnp.float32)
    h = jnp.tanh((h + b1).astype(act)).astype(jnp.float32)
    h = jnp.dot(h.astype(bf), w2.astype(bf), preferred_element_type=jnp.float32)
    h = jnp.tanh((h + b2).astype(act)).astype(jnp.float32)
    z = jnp.dot(h.astype(bf), w3.astype(bf), preferred_element_type=jnp.float32)
    return jax.nn.sigmoid(z + b3)


if __name__ == "__main__":
    key = jax.random.PRNGKey(0)
    kx, kp = jax.random.split(key)

    batch, input_num = 16, 128
    x = jax.random.normal(kx, (batch, input_num), jnp.float32)
    params = init_params(kp, input_num)

    use_bf16_act = _use_bf16_activations()
    prepared = prepare_params(*params)          # one-time weight cast/pad

    out = moa_forward_prepared(x, *prepared, block_b=512,
                               use_bf16_act=use_bf16_act)
    out = jax.block_until_ready(out)
    assert out.shape == (batch, OUT)
    assert bool(jnp.all(jnp.isfinite(out)))

    # Tight check vs. a reference using the identical bf16-matmul/act path.
    ref_match = reference_forward_kernel_path(x, *params, use_bf16_act)
    assert jnp.allclose(out, ref_match, atol=1e-2, rtol=0), \
        "mismatch vs kernel-path reference"

    # Looser sanity check vs. the full-f32 reference (bf16 rounding only).
    ref_f32 = reference_forward_f32(x, *params)
    assert jnp.allclose(out, ref_f32, atol=5e-2, rtol=0), \
        "mismatch vs f32 reference"

    print("KERNEL_OK")
</pallas_src>

<mosaic_0001>
module attributes {stable_mosaic.version = 11 : i64} {
  func.func @moa_kernel(%arg0: i32, %arg1: memref<8x128xf32, #tpu.memory_space<vmem>>, %arg2: memref<128x1024xbf16, #tpu.memory_space<vmem>>, %arg3: memref<1x1024xf32, #tpu.memory_space<vmem>>, %arg4: memref<1024x512xbf16, #tpu.memory_space<vmem>>, %arg5: memref<1x512xf32, #tpu.memory_space<vmem>>, %arg6: memref<512x256xbf16, #tpu.memory_space<vmem>>, %arg7: memref<1x256xf32, #tpu.memory_space<vmem>>, %arg8: memref<8x256xf32, #tpu.memory_space<vmem>>) attributes {dimension_semantics = [#tpu.dimension_semantics<parallel>], iteration_bounds = array<i64: 2>, scalar_prefetch = 0 : i64, scratch_operands = 0 : i64, tpu.core_type = #tpu.core_type<tc>, window_params = [{transform_indices = @transform_0, window_bounds = array<i64: 8, 128>}, {pipeline_mode = #tpu.pipeline_mode<synchronous>, transform_indices = @transform_1, window_bounds = array<i64: 128, 1024>}, {pipeline_mode = #tpu.pipeline_mode<synchronous>, transform_indices = @transform_2, window_bounds = array<i64: 1, 1024>}, {pipeline_mode = #tpu.pipeline_mode<synchronous>, transform_indices = @transform_3, window_bounds = array<i64: 1024, 512>}, {pipeline_mode = #tpu.pipeline_mode<synchronous>, transform_indices = @transform_4, window_bounds = array<i64: 1, 512>}, {pipeline_mode = #tpu.pipeline_mode<synchronous>, transform_indices = @transform_5, window_bounds = array<i64: 512, 256>}, {pipeline_mode = #tpu.pipeline_mode<synchronous>, transform_indices = @transform_6, window_bounds = array<i64: 1, 256>}, {transform_indices = @transform_7, window_bounds = array<i64: 8, 256>}]} {
    %c0 = arith.constant 0 : index
    %c0_0 = arith.constant 0 : index
    %0 = vector.load %arg1[%c0, %c0_0] : memref<8x128xf32, #tpu.memory_space<vmem>>, vector<8x128xf32>
    %1 = arith.truncf %0 : vector<8x128xf32> to vector<8x128xbf16>
    %c0_1 = arith.constant 0 : index
    %c0_2 = arith.constant 0 : index
    %2 = vector.load %arg2[%c0_1, %c0_2] : memref<128x1024xbf16, #tpu.memory_space<vmem>>, vector<128x1024xbf16>
    %cst = arith.constant dense<0.000000e+00> : vector<8x1024xf32>
    %3 = tpu.matmul %1, %2, %cst {dimension_numbers = #tpu.dot_dimension_numbers<[1], [0], [0], [1], [0, 0, 1, 1], [], []>} : vector<8x128xbf16>, vector<128x1024xbf16>, vector<8x1024xf32> -> vector<8x1024xf32>
    %c0_3 = arith.constant 0 : index
    %c0_4 = arith.constant 0 : index
    %4 = vector.load %arg3[%c0_3, %c0_4] : memref<1x1024xf32, #tpu.memory_space<vmem>>, vector<1x1024xf32>
    %5 = vector.broadcast %4 : vector<1x1024xf32> to vector<8x1024xf32>
    %6 = arith.addf %3, %5 : vector<8x1024xf32>
    %7 = math.tanh %6 : vector<8x1024xf32>
    %8 = arith.truncf %7 : vector<8x1024xf32> to vector<8x1024xbf16>
    %c0_5 = arith.constant 0 : index
    %c0_6 = arith.constant 0 : index
    %9 = vector.load %arg4[%c0_5, %c0_6] : memref<1024x512xbf16, #tpu.memory_space<vmem>>, vector<1024x512xbf16>
    %cst_7 = arith.constant dense<0.000000e+00> : vector<8x512xf32>
    %10 = tpu.matmul %8, %9, %cst_7 {dimension_numbers = #tpu.dot_dimension_numbers<[1], [0], [0], [1], [0, 0, 1, 1], [], []>} : vector<8x1024xbf16>, vector<1024x512xbf16>, vector<8x512xf32> -> vector<8x512xf32>
    %c0_8 = arith.constant 0 : index
    %c0_9 = arith.constant 0 : index
    %11 = vector.load %arg5[%c0_8, %c0_9] : memref<1x512xf32, #tpu.memory_space<vmem>>, vector<1x512xf32>
    %12 = vector.broadcast %11 : vector<1x512xf32> to vector<8x512xf32>
    %13 = arith.addf %10, %12 : vector<8x512xf32>
    %14 = math.tanh %13 : vector<8x512xf32>
    %15 = arith.truncf %14 : vector<8x512xf32> to vector<8x512xbf16>
    %c0_10 = arith.constant 0 : index
    %c0_11 = arith.constant 0 : index
    %16 = vector.load %arg6[%c0_10, %c0_11] : memref<512x256xbf16, #tpu.memory_space<vmem>>, vector<512x256xbf16>
    %cst_12 = arith.constant dense<0.000000e+00> : vector<8x256xf32>
    %17 = tpu.matmul %15, %16, %cst_12 {dimension_numbers = #tpu.dot_dimension_numbers<[1], [0], [0], [1], [0, 0, 1, 1], [], []>} : vector<8x512xbf16>, vector<512x256xbf16>, vector<8x256xf32> -> vector<8x256xf32>
    %c0_13 = arith.constant 0 : index
    %c0_14 = arith.constant 0 : index
    %18 = vector.load %arg7[%c0_13, %c0_14] : memref<1x256xf32, #tpu.memory_space<vmem>>, vector<1x256xf32>
    %19 = vector.broadcast %18 : vector<1x256xf32> to vector<8x256xf32>
    %20 = arith.addf %17, %19 : vector<8x256xf32>
    %21 = arith.negf %20 : vector<8x256xf32>
    %22 = math.exp %21 : vector<8x256xf32>
    %cst_15 = arith.constant 1.000000e+00 : f32
    %23 = vector.broadcast %cst_15 : f32 to vector<8x256xf32>
    %24 = arith.addf %23, %22 : vector<8x256xf32>
    %25 = arith.divf %23, %24 : vector<8x256xf32>
    %c0_16 = arith.constant 0 : index
    %c0_17 = arith.constant 0 : index
    %26 = vector.load %arg8[%c0_16, %c0_17] : memref<8x256xf32, #tpu.memory_space<vmem>>, vector<8x256xf32>
    tpu.vector_store %arg8[%c0_16, %c0_17], %25 {strides = array<i32>} : memref<8x256xf32, #tpu.memory_space<vmem>>, vector<8x256xf32>,
    return
  }
  func.func @transform_0(%arg0: i32) -> (i32, i32) {
    %c0_i32 = arith.constant 0 : i32
    %c0_i32_0 = arith.constant 0 : i32
    return %arg0, %c0_i32 : i32, i32
  }
  func.func @transform_1(%arg0: i32) -> (i32, i32) {
    %c0_i32 = arith.constant 0 : i32
    %c0_i32_0 = arith.constant 0 : i32
    %c0_i32_1 = arith.constant 0 : i32
    return %c0_i32, %c0_i32_0 : i32, i32
  }
  func.func @transform_2(%arg0: i32) -> (i32, i32) {
    %c0_i32 = arith.constant 0 : i32
    %c0_i32_0 = arith.constant 0 : i32
    %c0_i32_1 = arith.constant 0 : i32
    return %c0_i32, %c0_i32_0 : i32, i32
  }
  func.func @transform_3(%arg0: i32) -> (i32, i32) {
    %c0_i32 = arith.constant 0 : i32
    %c0_i32_0 = arith.constant 0 : i32
    %c0_i32_1 = arith.constant 0 : i32
    return %c0_i32, %c0_i32_0 : i32, i32
  }
  func.func @transform_4(%arg0: i32) -> (i32, i32) {
    %c0_i32 = arith.constant 0 : i32
    %c0_i32_0 = arith.constant 0 : i32
    %c0_i32_1 = arith.constant 0 : i32
    return %c0_i32, %c0_i32_0 : i32, i32
  }
  func.func @transform_5(%arg0: i32) -> (i32, i32) {
    %c0_i32 = arith.constant 0 : i32
    %c0_i32_0 = arith.constant 0 : i32
    %c0_i32_1 = arith.constant 0 : i32
    return %c0_i32, %c0_i32_0 : i32, i32
  }
  func.func @transform_6(%arg0: i32) -> (i32, i32) {
    %c0_i32 = arith.constant 0 : i32
    %c0_i32_0 = arith.constant 0 : i32
    %c0_i32_1 = arith.constant 0 : i32
    return %c0_i32, %c0_i32_0 : i32, i32
  }
  func.func @transform_7(%arg0: i32) -> (i32, i32) {
    %c0_i32 = arith.constant 0 : i32
    %c0_i32_0 = arith.constant 0 : i32
    return %arg0, %c0_i32 : i32, i32
  }
}

</mosaic_0001>

<bundles_post_ra>
// kernel: moa_forward_prepared.1
= control target key start
LH: loop header
LB: loop body
LE: loop exit
PB: predicated region body
PF: predicated region fallthrough
CT: control target
= control target key end

     0   :  { %s5060_s0 = inlined_call_operand.hbm [shape: f32[16,128], index: 0, kind: input, shape index: {}]   ;;  %s5061_s1 = inlined_call_operand.hbm [shape: bf16[128,1024], index: 1, kind: input, shape index: {}]   ;;  %s5062_s2 = inlined_call_operand.hbm [shape: f32[1,1024], index: 2, kind: input, shape index: {}]   ;;  %s5063_s3 = inlined_call_operand.hbm [shape: bf16[1024,512], index: 3, kind: input, shape index: {}]   ;;  %s5064_s4 = inlined_call_operand.vmem [shape: f32[1,512], index: 4, kind: input, shape index: {}]   ;;  %s5065_s5 = inlined_call_operand.hbm [shape: bf16[512,256], index: 5, kind: input, shape index: {}]   ;;  %s5066_s6 = inlined_call_operand.vmem [shape: f32[1,256], index: 6, kind: input, shape index: {}]   ;;  %s5067_s7 = inlined_call_operand.hbm [shape: f32[16,256], index: 7, kind: output, shape index: {}]  }
   0x1   :  { %5072 = sst [smem:[#allocation16_spill]] %s5061_s1 }
   0x2   :  { %5073 = sst [smem:[#allocation17_spill]] %s5062_s2 }
   0x3   :  { %12 = vsyncpa [#allocation3], 0 }
   0x4   :  { %14 = vsyncpa [#allocation3 + $0x1], 0 }
   0x5   :  { %15 = vsyncpa [#allocation6], 0 }
   0x6   :  { %16 = vsyncpa [#allocation9], 0 }
   0x7   :  { %17 = vsyncpa [#allocation4], 0 }
   0x8   :  { %19 = vsyncpa [#allocation4 + $0x1], 0  ;;  %s4741_s24 = smov 0   ;;  %s4743_s25 = smov 0  }
   0x9   :  { %s4745_s26 = smov 0   ;;  %s4747_s27 = smov 0  }
   0xa LB: > { %s4688_s28 = smov [#allocation5]   ;;  %s4762_s30 = sadd.s32 4294967295, %s4686_s27   ;;  %s4686_s27 = sphi %s4747_s27, %s5095_s27   ;;  %s4682_s26 = sphi %s4745_s26, %s5094_s26   ;;  %s4678_s25 = sphi %s4743_s25, %s5093_s25   ;;  %s4674_s24 = sphi %s4741_s24, %s5092_s24  }
   0xb   : > { %s220_s29 = sshll.u32 %s4688_s28, 4  ;;  %p3469_p0 = scmp.ge.s32.totalorder %s4686_s27, 1  ;;  %s221_s29 = int_to_ptr.vmem [resolvable:$true] %s220_s29 }
   0xc   : > { %p5068_p1 = scmp.eq.s32.totalorder %s4762_s30, 0  ;;  %p208_p2 = scmp.lt.s32.totalorder %s4686_s27, 3 }
   0xd   : > { %s4689_s9 = smov [#allocation8]   ;;  %s4690_s12 = smov [#allocation7]  }
   0xe   : > { %p4767_p3 = pnand %p3469_p0, %p208_p2  ;;  %s244_s10 = sshll.u32 %s4689_s9, 4  ;;  %s4780_s10 = int_to_ptr.vmem [resolvable:$true] %s244_s10 }
   0xf   : > { %s4782_s13 = sshll.u32 %s4690_s12, 4  ;;  %s4493_s14 = scalar_lea.vmem %s221_s29, 8192  ;;  %s235_s13 = int_to_ptr.vmem [resolvable:$true] %s4782_s13 }
  0x10   : > { %s5074_s8 = scalar_select %p4767_p3, 1, 0 }
  0x11   : > { %p3896_p5 = pneg %p4767_p3  ;;  %p4494_p8 = scmp.ne.s32.totalorder %s221_s29, %s4493_s14 }
  0x12   : > { %p4501_p11 = scmp.lt.s32.totalorder %s221_s29, %s221_s29  ;;  %p4502_p12 = scmp.lt.s32.totalorder %s4493_s14, %s4493_s14 }
  0x13   : > { %p4776_p6 = pnand %p3896_p5, %p5068_p1 }
  0x14   : > { %p4503_p13 = por %p4502_p12, %p4501_p11 }
  0x15   : > { %p4484_p7 = pneg %p4776_p6 }
  0x17   : > { %p4496_p9 = pnand %p4494_p8, %p4484_p7 }
  0x19   : > { %p4497_p10 = pneg %p4496_p9 }
  0x1b   : > { %p4504_p0 = pnand %p4503_p13, %p4497_p10 }
  0x1d   : > { %4507 = shalt.err (!%p4504_p0)
}
  0x1e   : > { %s4691_s15 = smov 512   ;;  %s4692_s16 = smov 32  }
  0x1f   : > { %s5076_s1 = sld [smem:[#allocation16_spill]]  ;;  %s4519_s19 = scalar_lea.vmem %s4780_s10, 32768 }
  0x20   : > { %p4520_p2 = scmp.ne.s32.totalorder %s4780_s10, %s4519_s19  ;;  %p4527_p9 = scmp.lt.s32.totalorder %s4780_s10, %s4780_s10 }
  0x21   : > { %p4528_p10 = scmp.lt.s32.totalorder %s4519_s19, %s4519_s19 }
  0x22   : > { %p4522_p5 = pnand %p4520_p2, %p4484_p7 }
  0x23   : > { %p4529_p11 = por %p4528_p10, %p4527_p9 }
  0x24   : > { %p4523_p8 = pneg %p4522_p5 }
  0x25   : > { %3899 = dma.hbm_to_vmem [thread:$0]  (!%p4776_p6), %s5076_s1, 8192, %s221_s29, [#allocation6], %s4691_s15, %s4691_s15, %s4692_s16  }
  0x26   : > { %p4530_p12 = pnand %p4529_p11, %p4523_p8 }
  0x28   : > { %4533 = shalt.err (!%p4530_p12)
}
  0x29   : > { %s4693_s20 = smov 256   ;;  %s4694_s21 = smov 16  }
  0x2a   : > { %3905 = dma.hbm_to_vmem [thread:$0]  (!%p4776_p6), %s5063_s3, 32768, %s4780_s10, [#allocation9], %s4693_s20, %s4693_s20, %s4694_s21  }
  0x2b   : > { %s4545_s28 = scalar_lea.vmem %s235_s13, 128  ;;  %p4553_p5 = scmp.lt.s32.totalorder %s235_s13, %s235_s13 }
  0x2c   : > { %p4546_p13 = scmp.ne.s32.totalorder %s235_s13, %s4545_s28  ;;  %p4554_p8 = scmp.lt.s32.totalorder %s4545_s28, %s4545_s28 }
  0x2e   : > { %p4548_p0 = pnand %p4546_p13, %p4484_p7  ;;  %p4555_p9 = por %p4554_p8, %p4553_p5 }
  0x30   : > { %p4549_p2 = pneg %p4548_p0 }
  0x32   : > { %p4556_p10 = pnand %p4555_p9, %p4549_p2 }
  0x34   : > { %4559 = shalt.err (!%p4556_p10)
}
  0x35   : > { %s5077_s2 = sld [smem:[#allocation17_spill]]  ;;  %s4695_s10 = smov [#allocation10]  }
  0x36   : > { %s260_s12 = sshll.u32 %s4695_s10, 4  ;;  %s261_s12 = int_to_ptr.vmem [resolvable:$true] %s260_s12 }
  0x37   : > { %s4571_s14 = scalar_lea.vmem %s261_s12, 8192  ;;  %p4579_p0 = scmp.lt.s32.totalorder %s261_s12, %s261_s12 }
  0x38   : > { %p4572_p11 = scmp.ne.s32.totalorder %s261_s12, %s4571_s14  ;;  %p4580_p5 = scmp.lt.s32.totalorder %s4571_s14, %s4571_s14 }
  0x3a   : > { %p4574_p12 = pnand %p4572_p11, %p4484_p7  ;;  %p4581_p2 = por %p4580_p5, %p4579_p0 }
  0x3b   : > { %3902 = dma.hbm_to_vmem [thread:$0]  (!%p4776_p6), %s5077_s2, 128, %s235_s13, [#allocation6]  }
  0x3c   : > { %p4575_p13 = pneg %p4574_p12 }
  0x3e   : > { %p4582_p8 = pnand %p4581_p2, %p4575_p13 }
  0x40   : > { %4585 = shalt.err (!%p4582_p8)
}
  0x41   : > { %s4696_s15 = smov 128   ;;  %s4697_s13 = smov 8  }
  0x42   : > { %3908 = dma.hbm_to_vmem [thread:$0]  (!%p4776_p6), %s5065_s5, 8192, %s261_s12, [#allocation9], %s4696_s15, %s4696_s15, %s4697_s13  }
  0x43   : > { %s3468_s18 = sadd.s32 4294967294, %s4686_s27   ;;  %s4826_s19 = sadd.s32 1, %s4686_s27  }
  0x44   : > { %s29_s20 = ssub.s32 %s4686_s27, %s4826_s19  ;;  %s32_s21 = sadd.s32 1, %s4682_s26 }
  0x45   : > { %p30_p7 = scmp.eq.s32.totalorder %s29_s20, 0  ;;  %p39_p9 = scmp.ne.s32.totalorder %s4682_s26, %s4678_s25 }
  0x46   : > { %p40_p10 = scmp.eq.s32.totalorder %s4686_s27, 0  ;;  %p45_p11 = scmp.ne.s32.totalorder %s4678_s25, %s4674_s24 }
  0x47   : > { %s4837_s22 = scalar_select %p30_p7, %s4682_s26, %s32_s21  }
  0x48   : > { %p4839_p12 = por %p40_p10, %p39_p9  ;;  %p4845_p6 = por %p5068_p1, %p45_p11 }
  0x49   : > { %p195_p13 = scmp.eq.s32.totalorder %s4762_s30, 1  ;;  %p201_p0 = scmp.eq.s32.totalorder %s3468_s18, 1 }
  0x4a   : > { %s5079_s23 = scalar_select %p4845_p6, 1, 0 }
  0x4b   : > { %p3921_p5 = scmp.lt.s32.totalorder %s4686_s27, 2  ;;  %s277_s28 = sand.u32 1, %s4682_s26  }
  0x4c   : > { %p4852_p2 = por %p195_p13, %p39_p9  ;;  %p4856_p8 = por %p201_p0, %p45_p11 }
  0x4d   : > { %s3475_s10 = sshll.u32 %s277_s28, 3  ;;  %s3476_s12 = sshll.u32 %s4686_s27, 7 }
  0x4e   : > { %s5080_s29 = scalar_select %p4852_p2, 1, 0 }
  0x4f   : > { %s5081_s9 = scalar_select %p4856_p8, 1, 0 }
  0x50   : > { %s4864_s13 = scalar_lea.hbm %s5060_s0, %s3476_s12  ;;  %s281_s16 = scalar_lea.vmem [#allocation2], %s3475_s10 }
  0x51   : > { %s288_s17 = sshll.u32 %s281_s16, 4  ;;  %p4868_p7 = pnand %p3921_p5, %p4839_p12  ;;  %s289_s17 = int_to_ptr.vmem [resolvable:$true] %s288_s17 }
  0x52   : > { %s278_s20 = scalar_lea.sflag [#allocation3], %s277_s28  ;;  %s4586_s21 = scalar_lea.hbm %s4864_s13, 128 }
  0x53   : > { %p4587_p9 = scmp.ne.s32.totalorder %s4864_s13, %s4586_s21  ;;  %p4588_p10 = pneg %p4868_p7 }
  0x54   : > { %s4591_s15 = scalar_lea.hbm %s5060_s0, 256  ;;  %p4592_p0 = scmp.lt.s32.totalorder %s4864_s13, %s5060_s0 }
  0x55   : > { %p4589_p11 = pnand %p4588_p10, %p4587_p9  ;;  %p4593_p12 = scmp.lt.s32.totalorder %s4591_s15, %s4586_s21 }
  0x57   : > { %p4590_p13 = pneg %p4589_p11  ;;  %p4594_p5 = por %p4593_p12, %p4592_p0 }
  0x59   : > { %p4595_p4 = pnand %p4594_p5, %p4590_p13 }
  0x5b   : > { %4598 = shalt.err (!%p4595_p4)
}
  0x5c   : > { %s4599_s11 = scalar_lea.vmem %s289_s17, 128  ;;  %s4698_s28 = smov [#allocation2]  }
  0x5d   : > { %p4600_p1 = scmp.ne.s32.totalorder %s289_s17, %s4599_s11  ;;  %s4604_s1 = sshll.u32 %s4698_s28, 4  ;;  %s4605_s1 = int_to_ptr.vmem [resolvable:$false] %s4604_s1 }
  0x5e   : > { %s4606_s2 = scalar_lea.vmem %s4605_s1, 256  ;;  %p4607_p9 = scmp.lt.s32.totalorder %s289_s17, %s4605_s1 }
  0x5f   : > { %p4602_p8 = pnand %p4600_p1, %p4588_p10  ;;  %p4608_p11 = scmp.lt.s32.totalorder %s4606_s2, %s4599_s11 }
  0x61   : > { %p4603_p2 = pneg %p4602_p8  ;;  %p4609_p6 = por %p4608_p11, %p4607_p9 }
  0x63   : > { %p4610_p3 = pnand %p4609_p6, %p4603_p2 }
  0x65   : > { %4613 = shalt.err (!%p4610_p3)
}
  0x66   : > { %3912 = dma.hbm_to_vmem [thread:$0]  (!%p4868_p7), %s4864_s13, 128, %s289_s17, %s278_s20  }
  0x67   : > { %p5083_p13 = scmp.ne.s32.totalorder %s5074_s8, 0 }
  0x68   : > { %s4889_s21 = sand.u32 (!%p5083_p13), 1, %s4678_s25   ;;  %p5084_p1 = scmp.ne.s32.totalorder (!%p5083_p13), %s5079_s23, 0 }
  0x69   : > { %297 = sbr.rel (%p5083_p13) target bundleno = 1017 (0x3f9), region = 48  ;;  %s3478_s12 = sshll.u32 (!%p5083_p13), %s4889_s21, 3 }
  0x6a   : > { %s300_s14 = scalar_lea.sflag (!%p5083_p13), [#allocation3], %s4889_s21  ;;  %s4893_s1 = scalar_lea.vmem (!%p5083_p13), [#allocation2], %s3478_s12 }
  0x6e   : > { %4657 = dma.done.wait (%p5084_p1), %s300_s14, 128  }
  0x6f   : > { %4659 = vsyncadd (%p5084_p1), %s300_s14, 4294967168  ;;  %p5085_p3 = scmp.eq.s32.totalorder %s4762_s30, 0 }
  0x71   : > { %4661 = dma.done.wait (%p5085_p3), [#allocation6], 8320   ;;  %p5086_p4 = pmov %p5085_p3 }
  0x72   : > { %p5087_p6 = pmov %p5085_p3 }
  0x73   : > { %4663 = vsyncadd (%p5086_p4), [#allocation6], 4294958976 }
  0x74   : > { %4665 = dma.done.wait (%p5087_p6), [#allocation9], 40960   ;;  %p5088_p2 = pmov %p5085_p3 }
  0x75   : > { %v4699_v0 = vmov 0   ;;  %v409_v1 = vld [vmem:[#allocation5 + $0x1c0] sm:$0xff]  ;;  %v410_v3 = vld [vmem:[#allocation5 + $0x1c8] sm:$0xff]  ;;  %v411_v62 = vld [vmem:[#allocation5 + $0x1d0] sm:$0xff]  ;;  %s3483_s17 = sshll.u32 %s4889_s21, 4  ;;  %s3875_s18 = sshll.u32 %s4762_s30, 8 }
  0x76   : > { %4667 = vsyncadd (%p5088_p2), [#allocation9], 4294926336  ;;  %811 = vmatprep.mubr.bf16.mxu0 %v4699_v0  ;;  %852 = vmatprep.mubr.bf16.mxu1 %v4699_v0  ;;  %v413_v2 = vld [vmem:[#allocation5 + $0x1e0] sm:$0xff]  ;;  %v414_v5 = vld [vmem:[#allocation5 + $0x1e8] sm:$0xff]  ;;  %s349_s20 = scalar_lea.vmem [#allocation11], %s3483_s17  ;;  %s5023_s11 = scalar_lea.hbm %s5067_s7, %s3875_s18 }
  0x77   : > { %v3541_v4 = vcombine.high %v409_v1, %v413_v2  ;;  %v3540_v6 = vcombine.low %v409_v1, %v413_v2  ;;  %v401_v7 = vld [vmem:[#allocation5 + $0x180] sm:$0xff]  ;;  %v3543_v9 = vcombine.high %v410_v3, %v414_v5  ;;  %v3542_v10 = vcombine.low %v410_v3, %v414_v5  ;;  %v402_v12 = vld [vmem:[#allocation5 + $0x188] sm:$0xff]  ;;  %v415_v1 = vld [vmem:[#allocation5 + $0x1f0] sm:$0xff]  ;;  %s3360_s15 = sshll.u32 %s349_s20, 4  ;;  %s3346_s28 = scalar_lea.sflag [#allocation4], %s4889_s21  ;;  %s3361_s15 = int_to_ptr.vmem [resolvable:$true] %s3360_s15 }
  0x78   : > { %v405_v8 = vld [vmem:[#allocation5 + $0x1a0] sm:$0xff]  ;;  %v406_v13 = vld [vmem:[#allocation5 + $0x1a8] sm:$0xff]  ;;  %v412_v2 = vld [vmem:[#allocation5 + $0x1d8] sm:$0xff]  ;;  %s4614_s12 = scalar_lea.vmem %s3361_s15, 256  ;;  %p5089_p7 = scmp.ne.s32.totalorder %s5080_s29, 0 }
  0x79   : > { %v3533_v11 = vcombine.high %v401_v7, %v405_v8  ;;  %v393_v14 = vld [vmem:[#allocation5 + $0x140] sm:$0xff]  ;;  %779 = vmatprep.subr.bf16.mxu0 %v3541_v4  ;;  %v3535_v15 = vcombine.high %v402_v12, %v406_v13  ;;  %v394_v17 = vld [vmem:[#allocation5 + $0x148] sm:$0xff]  ;;  %820 = vmatprep.subr.bf16.mxu1 %v3543_v9  ;;  %v3532_v19 = vcombine.low %v401_v7, %v405_v8  ;;  %v416_v3 = vld [vmem:[#allocation5 + $0x1f8] sm:$0xff]  ;;  %p4615_p8 = scmp.ne.s32.totalorder %s3361_s15, %s4614_s12  ;;  %s4700_s14 = smov [#allocation11]  }
  0x7a   : > { %v397_v16 = vld [vmem:[#allocation5 + $0x160] sm:$0xff]  ;;  %v398_v18 = vld [vmem:[#allocation5 + $0x168] sm:$0xff]  ;;  %780 = vmatpush1.bf16.msra.mxu0 %v3540_v6  ;;  %821 = vmatpush1.bf16.msra.mxu1 %v3542_v10  ;;  %v3534_v20 = vcombine.low %v402_v12, %v406_v13  ;;  %v351_v5 = vld [vmem:[%s4893_s1] sm:$0xff]  ;;  %v3545_v7 = vcombine.high %v411_v62, %v415_v1  ;;  %v3547_v9 = vcombine.high %v412_v2, %v416_v3  ;;  %s4618_s30 = sshll.u32 %s4700_s14, 4  ;;  %s4619_s30 = int_to_ptr.vmem [resolvable:$false] %s4618_s30 }
  0x7b   : > { %781 = vmatprep.subr.bf16.mxu0 %v3533_v11  ;;  %v3525_v21 = vcombine.high %v393_v14, %v397_v16  ;;  %822 = vmatprep.subr.bf16.mxu1 %v3535_v15  ;;  %v3527_v22 = vcombine.high %v394_v17, %v398_v18  ;;  %v385_v23 = vld [vmem:[#allocation5 + $0x100] sm:$0xff]  ;;  %v386_v25 = vld [vmem:[#allocation5 + $0x108] sm:$0xff]  ;;  %v3524_v27 = vcombine.low %v393_v14, %v397_v16  ;;  %v403_v8 = vld [vmem:[#allocation5 + $0x190] sm:$0xff]  ;;  %p4616_p10 = pnand %p4615_p8, %p5089_p7  ;;  %s4620_s1 = scalar_lea.vmem %s4619_s30, 512 }
  0x7c   : > { %v389_v24 = vld [vmem:[#allocation5 + $0x120] sm:$0xff]  ;;  %v390_v26 = vld [vmem:[#allocation5 + $0x128] sm:$0xff]  ;;  %v3526_v28 = vcombine.low %v394_v17, %v398_v18  ;;  %v407_v10 = vld [vmem:[#allocation5 + $0x1b0] sm:$0xff]  ;;  %v4910_v12 = vpack.c.bf16 %v351_v5, %v351_v5  ;;  %v3544_v14 = vcombine.low %v411_v62, %v415_v1  ;;  %v3546_v15 = vcombine.low %v412_v2, %v416_v3  ;;  %p4621_p12 = scmp.lt.s32.totalorder %s3361_s15, %s4619_s30  ;;  %p4622_p5 = scmp.lt.s32.totalorder %s4620_s1, %s4614_s12 }
  0x7d   : > { %v3517_v29 = vcombine.high %v385_v23, %v389_v24  ;;  %v3519_v30 = vcombine.high %v386_v25, %v390_v26  ;;  %v377_v31 = vld [vmem:[#allocation5 + $0xc0] sm:$0xff]  ;;  %v378_v33 = vld [vmem:[#allocation5 + $0xc8] sm:$0xff]  ;;  %v3516_v35 = vcombine.low %v385_v23, %v389_v24  ;;  %v3518_v36 = vcombine.low %v386_v25, %v390_v26  ;;  %v404_v11 = vld [vmem:[#allocation5 + $0x198] sm:$0xff]  ;;  %p4617_p0 = pneg %p4616_p10 }
  0x7e   : > { %782 = vmatpush1.bf16.msra.mxu0 %v3532_v19  ;;  %823 = vmatpush1.bf16.msra.mxu1 %v3534_v20  ;;  %v381_v32 = vld [vmem:[#allocation5 + $0xe0] sm:$0xff]  ;;  %v382_v34 = vld [vmem:[#allocation5 + $0xe8] sm:$0xff]  ;;  %v408_v13 = vld [vmem:[#allocation5 + $0x1b8] sm:$0xff]  ;;  %v3537_v16 = vcombine.high %v403_v8, %v407_v10  ;;  %p4623_p9 = por %p4622_p5, %p4621_p12 }
  0x7f   : > { %783 = vmatprep.subr.bf16.mxu0 %v3525_v21  ;;  %824 = vmatprep.subr.bf16.mxu1 %v3527_v22  ;;  %v3509_v37 = vcombine.high %v377_v31, %v381_v32  ;;  %v3511_v38 = vcombine.high %v378_v33, %v382_v34  ;;  %v369_v39 = vld [vmem:[#allocation5 + $0x80] sm:$0xff]  ;;  %v370_v41 = vld [vmem:[#allocation5 + $0x88] sm:$0xff]  ;;  %v3508_v43 = vcombine.low %v377_v31, %v381_v32  ;;  %v395_v17 = vld [vmem:[#allocation5 + $0x150] sm:$0xff] }
  0x80   : > { %v373_v40 = vld [vmem:[#allocation5 + $0xa0] sm:$0xff]  ;;  %v374_v42 = vld [vmem:[#allocation5 + $0xa8] sm:$0xff]  ;;  %v3510_v44 = vcombine.low %v378_v33, %v382_v34  ;;  %v3539_v18 = vcombine.high %v404_v11, %v408_v13  ;;  %v399_v19 = vld [vmem:[#allocation5 + $0x170] sm:$0xff]  ;;  %v3536_v22 = vcombine.low %v403_v8, %v407_v10  ;;  %v3538_v23 = vcombine.low %v404_v11, %v408_v13  ;;  %p4624_p11 = pnand %p4623_p9, %p4617_p0 }
  0x81   : > { %v3501_v45 = vcombine.high %v369_v39, %v373_v40  ;;  %v3503_v46 = vcombine.high %v370_v41, %v374_v42  ;;  %v361_v47 = vld [vmem:[#allocation5 + $0x40] sm:$0xff]  ;;  %v362_v49 = vld [vmem:[#allocation5 + $0x48] sm:$0xff]  ;;  %v3500_v51 = vcombine.low %v369_v39, %v373_v40  ;;  %v3502_v52 = vcombine.low %v370_v41, %v374_v42  ;;  %v396_v20 = vld [vmem:[#allocation5 + $0x158] sm:$0xff] }
  0x82   : > { %784 = vmatpush1.bf16.msra.mxu0 %v3524_v27  ;;  %825 = vmatpush1.bf16.msra.mxu1 %v3526_v28  ;;  %v365_v48 = vld [vmem:[#allocation5 + $0x60] sm:$0xff]  ;;  %v366_v50 = vld [vmem:[#allocation5 + $0x68] sm:$0xff]  ;;  %v400_v21 = vld [vmem:[#allocation5 + $0x178] sm:$0xff]  ;;  %v3529_v24 = vcombine.high %v395_v17, %v399_v19 }
  0x83   : > { %785 = vmatprep.subr.bf16.mxu0 %v3517_v29  ;;  %826 = vmatprep.subr.bf16.mxu1 %v3519_v30  ;;  %v3493_v53 = vcombine.high %v361_v47, %v365_v48  ;;  %v353_v54 = vld [vmem:[#allocation5] sm:$0xff]  ;;  %v3495_v55 = vcombine.high %v362_v49, %v366_v50  ;;  %v354_v57 = vld [vmem:[#allocation5 + $0x8] sm:$0xff]  ;;  %v3492_v59 = vcombine.low %v361_v47, %v365_v48  ;;  %v387_v25 = vld [vmem:[#allocation5 + $0x110] sm:$0xff] }
  0x84   : > { %v357_v56 = vld [vmem:[#allocation5 + $0x20] sm:$0xff]  ;;  %v358_v58 = vld [vmem:[#allocation5 + $0x28] sm:$0xff]  ;;  %v3494_v60 = vcombine.low %v362_v49, %v366_v50  ;;  %v3531_v26 = vcombine.high %v396_v20, %v400_v21  ;;  %v391_v27 = vld [vmem:[#allocation5 + $0x130] sm:$0xff]  ;;  %v3528_v30 = vcombine.low %v395_v17, %v399_v19  ;;  %v3530_v31 = vcombine.low %v396_v20, %v400_v21 }
  0x85   : > { %v3485_v61 = vcombine.high %v353_v54, %v357_v56  ;;  %v3487_v63 = vcombine.high %v354_v57, %v358_v58  ;;  %v3484_v4 = vcombine.low %v353_v54, %v357_v56  ;;  %v3486_v6 = vcombine.low %v354_v57, %v358_v58  ;;  %v388_v28 = vld [vmem:[#allocation5 + $0x118] sm:$0xff]  ;;  %v379_v33 = vld [vmem:[#allocation5 + $0xd0] sm:$0xff] }
  0x86   : > { %786 = vmatpush1.bf16.msra.mxu0 %v3516_v35  ;;  %827 = vmatpush1.bf16.msra.mxu1 %v3518_v36  ;;  %v392_v29 = vld [vmem:[#allocation5 + $0x138] sm:$0xff]  ;;  %v3521_v32 = vcombine.high %v387_v25, %v391_v27  ;;  %v383_v35 = vld [vmem:[#allocation5 + $0xf0] sm:$0xff] }
  0x87   : > { %787 = vmatprep.subr.bf16.mxu0 %v3509_v37  ;;  %828 = vmatprep.subr.bf16.mxu1 %v3511_v38  ;;  %v3523_v34 = vcombine.high %v388_v28, %v392_v29  ;;  %v380_v36 = vld [vmem:[#allocation5 + $0xd8] sm:$0xff]  ;;  %v3520_v38 = vcombine.low %v387_v25, %v391_v27  ;;  %v3522_v39 = vcombine.low %v388_v28, %v392_v29  ;;  %v371_v41 = vld [vmem:[#allocation5 + $0x90] sm:$0xff] }
  0x88   : > { %v384_v37 = vld [vmem:[#allocation5 + $0xf8] sm:$0xff]  ;;  %v3513_v40 = vcombine.high %v379_v33, %v383_v35  ;;  %v375_v42 = vld [vmem:[#allocation5 + $0xb0] sm:$0xff] }
  0x89   : > { %v3505_v47 = vcombine.high %v371_v41, %v375_v42  ;;  %v363_v48 = vld [vmem:[#allocation5 + $0x50] sm:$0xff]  ;;  %v356_v58 = vld [vmem:[#allocation5 + $0x18] sm:$0xff] }
  0x8a   : > { %788 = vmatpush1.bf16.msra.mxu0 %v3508_v43  ;;  %829 = vmatpush1.bf16.msra.mxu1 %v3510_v44  ;;  %v372_v43 = vld [vmem:[#allocation5 + $0x98] sm:$0xff]  ;;  %v367_v50 = vld [vmem:[#allocation5 + $0x70] sm:$0xff] }
  0x8b   : > { %789 = vmatprep.subr.bf16.mxu0 %v3501_v45  ;;  %830 = vmatprep.subr.bf16.mxu1 %v3503_v46  ;;  %v376_v44 = vld [vmem:[#allocation5 + $0xb8] sm:$0xff]  ;;  %v3512_v45 = vcombine.low %v379_v33, %v383_v35  ;;  %v3514_v46 = vcombine.low %v380_v36, %v384_v37  ;;  %v355_v54 = vld [vmem:[#allocation5 + $0x10] sm:$0xff]  ;;  %v3497_v57 = vcombine.high %v363_v48, %v367_v50 }
  0x8c   : > { %v3507_v49 = vcombine.high %v372_v43, %v376_v44  ;;  %v3506_v56 = vcombine.low %v372_v43, %v376_v44  ;;  %v3972_v2 = vld [vmem:[#allocation8 + $0xe4] ss:$16 sps:$4 sm:$0xff]   ;;  %v3976_v10 = vld [vmem:[#allocation8 + $0xc0] ss:$16 sps:$4 sm:$0xff]  }
  0x8d   : > { %v3978_v8 = vld [vmem:[#allocation8 + $0xc4] ss:$16 sps:$4 sm:$0xff]   ;;  %v3979_v11 = vld [vmem:[#allocation8 + $0x2c0] ss:$16 sps:$4 sm:$0xff]  }
  0x8e   : > { %790 = vmatpush1.bf16.msra.mxu0 %v3500_v51  ;;  %831 = vmatpush1.bf16.msra.mxu1 %v3502_v52  ;;  %v364_v51 = vld [vmem:[#allocation5 + $0x58] sm:$0xff] }
  0x8f   : > { %791 = vmatprep.subr.bf16.mxu0 %v3493_v53  ;;  %832 = vmatprep.subr.bf16.mxu1 %v3495_v55  ;;  %v368_v52 = vld [vmem:[#allocation5 + $0x78] sm:$0xff]  ;;  %v3504_v53 = vcombine.low %v371_v41, %v375_v42  ;;  %v359_v55 = vld [vmem:[#allocation5 + $0x30] sm:$0xff] }
  0x90   : > { %v3498_v62 = vcombine.low %v364_v51, %v368_v52  ;;  %v3488_v3 = vcombine.low %v355_v54, %v359_v55  ;;  %v3984_v13 = vld [vmem:[#allocation8 + $0xa4] ss:$16 sps:$4 sm:$0xff]   ;;  %v3988_v19 = vld [vmem:[#allocation8 + $0x80] ss:$16 sps:$4 sm:$0xff]  }
  0x91   : > { %v3990_v17 = vld [vmem:[#allocation8 + $0x84] ss:$16 sps:$4 sm:$0xff]   ;;  %v3991_v20 = vld [vmem:[#allocation8 + $0x280] ss:$16 sps:$4 sm:$0xff]  }
  0x92   : > { %792 = vmatpush1.bf16.msra.mxu0 %v3492_v59  ;;  %833 = vmatpush1.bf16.msra.mxu1 %v3494_v60  ;;  %v360_v59 = vld [vmem:[#allocation5 + $0x38] sm:$0xff]  ;;  %v3499_v60 = vcombine.high %v364_v51, %v368_v52 }
  0x93   : > { %793 = vmatprep.subr.bf16.mxu0 %v3485_v61  ;;  %834 = vmatprep.subr.bf16.mxu1 %v3487_v63  ;;  %v3496_v61 = vcombine.low %v363_v48, %v367_v50  ;;  %v3489_v63 = vcombine.high %v355_v54, %v359_v55  ;;  %v3491_v1 = vcombine.high %v356_v58, %v360_v59  ;;  %v3996_v21 = vld [vmem:[#allocation8 + $0x64] ss:$16 sps:$4 sm:$0xff]   ;;  %v4003_v27 = vld [vmem:[#allocation8 + $0x240] ss:$16 sps:$4 sm:$0xff]  }
  0x94   : > { %v3490_v5 = vcombine.low %v356_v58, %v360_v59  ;;  %v4005_v25 = vld [vmem:[#allocation8 + $0x244] ss:$16 sps:$4 sm:$0xff]   ;;  %v4015_v35 = vld [vmem:[#allocation8 + $0x200] ss:$16 sps:$4 sm:$0xff]  }
  0x95   : > { %v4008_v28 = vld [vmem:[#allocation8 + $0x24] ss:$16 sps:$4 sm:$0xff]   ;;  %v4027_v42 = vld [vmem:[#allocation8 + $0x3c0] ss:$16 sps:$4 sm:$0xff]  }
  0x96   : > { %794 = vmatpush1.bf16.msra.mxu0 %v3484_v4  ;;  %835 = vmatpush1.bf16.msra.mxu1 %v3486_v6  ;;  %v3975_v4 = vld [vmem:[#allocation8 + $0x2e4] ss:$16 sps:$4 sm:$0xff]   ;;  %v3970_v6 = vld [vmem:[#allocation8 + $0xe0] ss:$16 sps:$4 sm:$0xff]  }
  0x97   : > { %861 = vmatprep.subr.bf16.mxu0 %v3545_v7  ;;  %902 = vmatprep.subr.bf16.mxu1 %v3547_v9  ;;  %v3973_v7 = vld [vmem:[#allocation8 + $0x2e0] ss:$16 sps:$4 sm:$0xff]   ;;  %v3981_v9 = vld [vmem:[#allocation8 + $0x2c4] ss:$16 sps:$4 sm:$0xff]  }
  0x98   : > { %v4011_v29 = vld [vmem:[#allocation8 + $0x224] ss:$16 sps:$4 sm:$0xff]   ;;  %v4039_v50 = vld [vmem:[#allocation8 + $0x380] ss:$16 sps:$4 sm:$0xff]  }
  0x99   : > { %812 = vmatmul.mubr.bf16.vlgmr.msra.gmra.mxu0 %v4910_v12  ;;  %853 = vmatmul.mubr.bf16.vlgmr.msra.gmra.mxu1 %v4910_v12  ;;  %v4017_v33 = vld [vmem:[#allocation8 + $0x204] ss:$16 sps:$4 sm:$0xff]   ;;  %v4045_v54 = vld [vmem:[#allocation8 + $0x360] ss:$16 sps:$4 sm:$0xff]  }
  0x9a   : > { %862 = vmatpush1.bf16.msra.mxu0 %v3544_v14  ;;  %903 = vmatpush1.bf16.msra.mxu1 %v3546_v15  ;;  %v3987_v14 = vld [vmem:[#allocation8 + $0x2a4] ss:$16 sps:$4 sm:$0xff]   ;;  %v3982_v15 = vld [vmem:[#allocation8 + $0xa0] ss:$16 sps:$4 sm:$0xff]  }
  0x9b   : > { %863 = vmatprep.subr.bf16.mxu0 %v3537_v16  ;;  %904 = vmatprep.subr.bf16.mxu1 %v3539_v18  ;;  %v3985_v16 = vld [vmem:[#allocation8 + $0x2a0] ss:$16 sps:$4 sm:$0xff]   ;;  %v3993_v18 = vld [vmem:[#allocation8 + $0x284] ss:$16 sps:$4 sm:$0xff]  }
  0x9c   : > { %893 = vmatprep.mubr.bf16.mxu0 %v4699_v0  ;;  %934 = vmatprep.mubr.bf16.mxu1 %v4699_v0  ;;  %v3515_v0 = vcombine.high %v380_v36, %v384_v37  ;;  %v4020_v36 = vld [vmem:[#allocation8 + $0x1e4] ss:$16 sps:$4 sm:$0xff]   ;;  %v4051_v58 = vld [vmem:[#allocation8 + $0x340] ss:$16 sps:$4 sm:$0xff]  }
  0x9d   : > { %v4023_v37 = vld [vmem:[#allocation8 + $0x3e4] ss:$16 sps:$4 sm:$0xff]  }
  0x9e   : > { %864 = vmatpush1.bf16.msra.mxu0 %v3536_v22  ;;  %905 = vmatpush1.bf16.msra.mxu1 %v3538_v23  ;;  %v3999_v22 = vld [vmem:[#allocation8 + $0x264] ss:$16 sps:$4 sm:$0xff]   ;;  %v3997_v23 = vld [vmem:[#allocation8 + $0x260] ss:$16 sps:$4 sm:$0xff]  }
  0x9f   : > { %865 = vmatprep.subr.bf16.mxu0 %v3529_v24  ;;  %906 = vmatprep.subr.bf16.mxu1 %v3531_v26  ;;  %v4002_v24 = vld [vmem:[#allocation8 + $0x44] ss:$16 sps:$4 sm:$0xff]   ;;  %v4000_v26 = vld [vmem:[#allocation8 + $0x40] ss:$16 sps:$4 sm:$0xff]  }
  0xa0   : > { %v4029_v41 = vld [vmem:[#allocation8 + $0x3c4] ss:$16 sps:$4 sm:$0xff]  }
  0xa1   : > { %v4032_v43 = vld [vmem:[#allocation8 + $0x1a4] ss:$16 sps:$4 sm:$0xff]  }
  0xa2   : > { %866 = vmatpush1.bf16.msra.mxu0 %v3528_v30  ;;  %907 = vmatpush1.bf16.msra.mxu1 %v3530_v31  ;;  %v4006_v30 = vld [vmem:[#allocation8 + $0x20] ss:$16 sps:$4 sm:$0xff]   ;;  %v4035_v44 = vld [vmem:[#allocation8 + $0x3a4] ss:$16 sps:$4 sm:$0xff]  }
  0xa3   : > { %867 = vmatprep.subr.bf16.mxu0 %v3521_v32  ;;  %908 = vmatprep.subr.bf16.mxu1 %v3523_v34  ;;  %v4009_v31 = vld [vmem:[#allocation8 + $0x220] ss:$16 sps:$4 sm:$0xff]   ;;  %v4014_v32 = vld [vmem:[#allocation8 + $0x4] ss:$16 sps:$4 sm:$0xff]  }
  0xa4   : > { %v4012_v34 = vld [vmem:[#allocation8] ss:$16 sps:$4 sm:$0xff]   ;;  %v4041_v48 = vld [vmem:[#allocation8 + $0x384] ss:$16 sps:$4 sm:$0xff]  }
  0xa5   : > { %v4044_v51 = vld [vmem:[#allocation8 + $0x164] ss:$16 sps:$4 sm:$0xff]  }
  0xa6   : > { %868 = vmatpush1.bf16.msra.mxu0 %v3520_v38  ;;  %909 = vmatpush1.bf16.msra.mxu1 %v3522_v39  ;;  %v4018_v38 = vld [vmem:[#allocation8 + $0x1e0] ss:$16 sps:$4 sm:$0xff]   ;;  %v4047_v52 = vld [vmem:[#allocation8 + $0x364] ss:$16 sps:$4 sm:$0xff]  }
  0xa7   : > { %869 = vmatprep.subr.bf16.mxu0 %v3513_v40  ;;  %910 = vmatprep.subr.bf16.mxu1 %v3515_v0  ;;  %v4021_v39 = vld [vmem:[#allocation8 + $0x3e0] ss:$16 sps:$4 sm:$0xff]   ;;  %v4026_v40 = vld [vmem:[#allocation8 + $0x1c4] ss:$16 sps:$4 sm:$0xff]  }
  0xa8   : > { %v4024_v0 = vld [vmem:[#allocation8 + $0x1c0] ss:$16 sps:$4 sm:$0xff]   ;;  %v4050_v55 = vld [vmem:[#allocation8 + $0x144] ss:$16 sps:$4 sm:$0xff]  }
  0xa9   : > { %v4056_v59 = vld [vmem:[#allocation8 + $0x124] ss:$16 sps:$4 sm:$0xff]  }
  0xaa   : > { %870 = vmatpush1.bf16.msra.mxu0 %v3512_v45  ;;  %911 = vmatpush1.bf16.msra.mxu1 %v3514_v46  ;;  %v4030_v45 = vld [vmem:[#allocation8 + $0x1a0] ss:$16 sps:$4 sm:$0xff]  }
  0xab   : > { %871 = vmatprep.subr.bf16.mxu0 %v3505_v47  ;;  %912 = vmatprep.subr.bf16.mxu1 %v3507_v49  ;;  %v4033_v46 = vld [vmem:[#allocation8 + $0x3a0] ss:$16 sps:$4 sm:$0xff]   ;;  %v4038_v47 = vld [vmem:[#allocation8 + $0x184] ss:$16 sps:$4 sm:$0xff]  }
  0xac   : > { %v4036_v49 = vld [vmem:[#allocation8 + $0x180] ss:$16 sps:$4 sm:$0xff]  }
  0xae   : > { %872 = vmatpush1.bf16.msra.mxu0 %v3504_v53  ;;  %913 = vmatpush1.bf16.msra.mxu1 %v3506_v56  ;;  %v4042_v53 = vld [vmem:[#allocation8 + $0x160] ss:$16 sps:$4 sm:$0xff]   ;;  %v4053_v56 = vld [vmem:[#allocation8 + $0x344] ss:$16 sps:$4 sm:$0xff]  }
  0xaf   : > { %873 = vmatprep.subr.bf16.mxu0 %v3497_v57  ;;  %914 = vmatprep.subr.bf16.mxu1 %v3499_v60  ;;  %v4048_v57 = vld [vmem:[#allocation8 + $0x140] ss:$16 sps:$4 sm:$0xff]   ;;  %v4059_v60 = vld [vmem:[#allocation8 + $0x324] ss:$16 sps:$4 sm:$0xff]  }
  0xb2   : > { %874 = vmatpush1.bf16.msra.mxu0 %v3496_v61  ;;  %915 = vmatpush1.bf16.msra.mxu1 %v3498_v62  ;;  %v4054_v61 = vld [vmem:[#allocation8 + $0x120] ss:$16 sps:$4 sm:$0xff]  }
  0xb3   : > { %875 = vmatprep.subr.bf16.mxu0 %v3489_v63  ;;  %916 = vmatprep.subr.bf16.mxu1 %v3491_v1  ;;  %v4057_v62 = vld [vmem:[#allocation8 + $0x320] ss:$16 sps:$4 sm:$0xff]   ;;  %v4062_v63 = vld [vmem:[#allocation8 + $0x104] ss:$16 sps:$4 sm:$0xff]  }
  0xb4   : > { %v4065_v1 = vld [vmem:[#allocation8 + $0x304] ss:$16 sps:$4 sm:$0xff]  }
  0xb6   : > { %876 = vmatpush1.bf16.msra.mxu0 %v3488_v3  ;;  %917 = vmatpush1.bf16.msra.mxu1 %v3490_v5  ;;  %v4063_v3 = vld [vmem:[#allocation8 + $0x300] ss:$16 sps:$4 sm:$0xff]   ;;  %v4071_v5 = vld [vmem:[#allocation8 + $0x6e4] ss:$16 sps:$4 sm:$0xff]  }
  0xb7   : > { %2517 = vmatprep.subr.bf16.mxu0 %v3972_v2  ;;  %2558 = vmatprep.subr.bf16.mxu1 %v3975_v4  ;;  %v4060_v2 = vld [vmem:[#allocation8 + $0x100] ss:$16 sps:$4 sm:$0xff]   ;;  %v4068_v4 = vld [vmem:[#allocation8 + $0x4e4] ss:$16 sps:$4 sm:$0xff]  }
  0xb9   : > { %894 = vmatmul.mubr.bf16.vlgmr.msra.gmra.mxu0 %v4910_v12  ;;  %935 = vmatmul.mubr.bf16.vlgmr.msra.gmra.mxu1 %v4910_v12  ;;  %v3994_v12 = vld [vmem:[#allocation8 + $0x60] ss:$16 sps:$4 sm:$0xff]  }
  0xba   : > { %2518 = vmatpush1.bf16.msra.mxu0 %v3970_v6  ;;  %2559 = vmatpush1.bf16.msra.mxu1 %v3973_v7  ;;  %v419_v6 = vlaneseq }
  0xbb   : > { %2519 = vmatprep.subr.bf16.mxu0 %v3978_v8  ;;  %2560 = vmatprep.subr.bf16.mxu1 %v3981_v9  ;;  %v4923_v9 = vld [vmem:[#allocation7] sm:$0xff] }
  0xbc   : > { %v4918_v7 = vshrl.u32 %v419_v6, 7  ;;  %v4096_v6 = vld [vmem:[#allocation8 + $0x440] ss:$16 sps:$4 sm:$0xff]  }
  0xbe   : > { %2520 = vmatpush1.bf16.msra.mxu0 %v3976_v10  ;;  %2561 = vmatpush1.bf16.msra.mxu1 %v3979_v11  ;;  %v4921_v8 = vsub.s32 0, %v4918_v7  ;;  %v429_v10 = vsub.s32 2, %v4918_v7  ;;  %v4927_v11 = vsub.s32 1, %v4918_v7 }
  0xbf   : > { %2521 = vmatprep.subr.bf16.mxu0 %v3984_v13  ;;  %2562 = vmatprep.subr.bf16.mxu1 %v3987_v14  ;;  %v433_v13 = vsub.s32 3, %v4918_v7 }
  0xc0   : > { %v422_v14 = vrot.slane %v4923_v9, %v4921_v8 }
  0xc2   : > { %2522 = vmatpush1.bf16.msra.mxu0 %v3982_v15  ;;  %2563 = vmatpush1.bf16.msra.mxu1 %v3985_v16  ;;  %v430_v15 = vrot.slane %v4923_v9, %v429_v10  ;;  %v426_v16 = vrot.slane %v4923_v9, %v4927_v11 }
  0xc3   : > { %2523 = vmatprep.subr.bf16.mxu0 %v3990_v17  ;;  %2564 = vmatprep.subr.bf16.mxu1 %v3993_v18  ;;  %v434_v18 = vrot.slane %v4923_v9, %v433_v13 }
  0xc6   : > { %2524 = vmatpush1.bf16.msra.mxu0 %v3988_v19  ;;  %2565 = vmatpush1.bf16.msra.mxu1 %v3991_v20 }
  0xc7   : > { %2525 = vmatprep.subr.bf16.mxu0 %v3996_v21  ;;  %2566 = vmatprep.subr.bf16.mxu1 %v3999_v22 }
  0xca   : > { %2526 = vmatpush1.bf16.msra.mxu0 %v3994_v12  ;;  %2567 = vmatpush1.bf16.msra.mxu1 %v3997_v23 }
  0xcb   : > { %2527 = vmatprep.subr.bf16.mxu0 %v4002_v24  ;;  %2568 = vmatprep.subr.bf16.mxu1 %v4005_v25 }
  0xce   : > { %2528 = vmatpush1.bf16.msra.mxu0 %v4000_v26  ;;  %2569 = vmatpush1.bf16.msra.mxu1 %v4003_v27 }
  0xcf   : > { %2529 = vmatprep.subr.bf16.mxu0 %v4008_v28  ;;  %2570 = vmatprep.subr.bf16.mxu1 %v4011_v29 }
  0xd2   : > { %2530 = vmatpush1.bf16.msra.mxu0 %v4006_v30  ;;  %2571 = vmatpush1.bf16.msra.mxu1 %v4009_v31 }
  0xd3   : > { %2531 = vmatprep.subr.bf16.mxu0 %v4014_v32  ;;  %2572 = vmatprep.subr.bf16.mxu1 %v4017_v33 }
  0xd6   : > { %2532 = vmatpush1.bf16.msra.mxu0 %v4012_v34  ;;  %2573 = vmatpush1.bf16.msra.mxu1 %v4015_v35  ;;  %v4066_v35 = vld [vmem:[#allocation8 + $0x4e0] ss:$16 sps:$4 sm:$0xff]  }
  0xd7   : > { %2533 = vmatprep.subr.bf16.mxu0 %v4020_v36  ;;  %2574 = vmatprep.subr.bf16.mxu1 %v4023_v37 }
  0xda   : > { %2534 = vmatpush2.bf16.msra.mxu0 %v4018_v38  ;;  %2575 = vmatpush2.bf16.msra.mxu1 %v4021_v39  ;;  %v4069_v38 = vld [vmem:[#allocation8 + $0x6e0] ss:$16 sps:$4 sm:$0xff]   ;;  %v4074_v39 = vld [vmem:[#allocation8 + $0x4c4] ss:$16 sps:$4 sm:$0xff]  }
  0xdb   : > { %2535 = vmatprep.subr.bf16.mxu0 %v4026_v40  ;;  %2576 = vmatprep.subr.bf16.mxu1 %v4029_v41  ;;  %v4077_v40 = vld [vmem:[#allocation8 + $0x6c4] ss:$16 sps:$4 sm:$0xff]   ;;  %v4072_v41 = vld [vmem:[#allocation8 + $0x4c0] ss:$16 sps:$4 sm:$0xff]  }
  0xde   : > { %2536 = vmatpush2.bf16.msra.mxu0 %v4024_v0  ;;  %2577 = vmatpush2.bf16.msra.mxu1 %v4027_v42  ;;  %v4075_v0 = vld [vmem:[#allocation8 + $0x6c0] ss:$16 sps:$4 sm:$0xff]   ;;  %v4080_v42 = vld [vmem:[#allocation8 + $0x4a4] ss:$16 sps:$4 sm:$0xff]  }
  0xdf   : > { %2537 = vmatprep.subr.bf16.mxu0 %v4032_v43  ;;  %2578 = vmatprep.subr.bf16.mxu1 %v4035_v44  ;;  %v4083_v43 = vld [vmem:[#allocation8 + $0x6a4] ss:$16 sps:$4 sm:$0xff]   ;;  %v4078_v44 = vld [vmem:[#allocation8 + $0x4a0] ss:$16 sps:$4 sm:$0xff]  }
  0xe2   : > { %2538 = vmatpush2.bf16.msra.mxu0 %v4030_v45  ;;  %2579 = vmatpush2.bf16.msra.mxu1 %v4033_v46  ;;  %v441_v45 = vsub.s32 5, %v4918_v7  ;;  %v4081_v46 = vld [vmem:[#allocation8 + $0x6a0] ss:$16 sps:$4 sm:$0xff]  }
  0xe3   : > { %2539 = vmatprep.subr.bf16.mxu0 %v4038_v47  ;;  %2580 = vmatprep.subr.bf16.mxu1 %v4041_v48  ;;  %v4086_v47 = vld [vmem:[#allocation8 + $0x484] ss:$16 sps:$4 sm:$0xff]   ;;  %v449_v48 = vsub.s32 7, %v4918_v7 }
  0xe6   : > { %2540 = vmatpush2.bf16.msra.mxu0 %v4036_v49  ;;  %2581 = vmatpush2.bf16.msra.mxu1 %v4039_v50  ;;  %v4089_v49 = vld [vmem:[#allocation8 + $0x684] ss:$16 sps:$4 sm:$0xff]   ;;  %v4084_v50 = vld [vmem:[#allocation8 + $0x480] ss:$16 sps:$4 sm:$0xff]  }
  0xe7   : > { %2541 = vmatprep.subr.bf16.mxu0 %v4044_v51  ;;  %2582 = vmatprep.subr.bf16.mxu1 %v4047_v52  ;;  %v442_v51 = vrot.slane %v4923_v9, %v441_v45  ;;  %v4087_v52 = vld [vmem:[#allocation8 + $0x680] ss:$16 sps:$4 sm:$0xff]  }
  0xe8   : > { %v4129_v45 = vld [vmem:[#allocation8 + $0x7a0] ss:$16 sps:$4 sm:$0xff]  }
  0xea   : > { %2542 = vmatpush2.bf16.msra.mxu0 %v4042_v53  ;;  %2583 = vmatpush2.bf16.msra.mxu1 %v4045_v54  ;;  %v4092_v53 = vld [vmem:[#allocation8 + $0x464] ss:$16 sps:$4 sm:$0xff]  }
  0xeb   : > { %2543 = vmatprep.subr.bf16.mxu0 %v4050_v55  ;;  %2584 = vmatprep.subr.bf16.mxu1 %v4053_v56  ;;  %v450_v55 = vrot.slane %v4923_v9, %v449_v48  ;;  %v4095_v56 = vld [vmem:[#allocation8 + $0x664] ss:$16 sps:$4 sm:$0xff]  }
  0xee   : > { %2544 = vmatpush2.bf16.msra.mxu0 %v4048_v57  ;;  %2585 = vmatpush2.bf16.msra.mxu1 %v4051_v58 }
  0xef   : > { %2545 = vmatprep.subr.bf16.mxu0 %v4056_v59  ;;  %2586 = vmatprep.subr.bf16.mxu1 %v4059_v60  ;;  %v4090_v59 = vld [vmem:[#allocation8 + $0x460] ss:$16 sps:$4 sm:$0xff]  }
  0xf2   : > { %2546 = vmatpush2.bf16.msra.mxu0 %v4054_v61  ;;  %2587 = vmatpush2.bf16.msra.mxu1 %v4057_v62  ;;  %v4093_v62 = vld [vmem:[#allocation8 + $0x660] ss:$16 sps:$4 sm:$0xff]  }
  0xf3   : > { %2547 = vmatprep.subr.bf16.mxu0 %v4062_v63  ;;  %2588 = vmatprep.subr.bf16.mxu1 %v4065_v1  ;;  %v4098_v63 = vld [vmem:[#allocation8 + $0x444] ss:$16 sps:$4 sm:$0xff]  }
  0xf6   : > { %2548 = vmatpush2.bf16.msra.mxu0 %v4060_v2  ;;  %2589 = vmatpush2.bf16.msra.mxu1 %v4063_v3  ;;  %v4101_v3 = vld [vmem:[#allocation8 + $0x644] ss:$16 sps:$4 sm:$0xff]  }
  0xf7   : > { %2599 = vmatprep.subr.bf16.mxu0 %v4068_v4  ;;  %2640 = vmatprep.subr.bf16.mxu1 %v4071_v5 }
 0x159   : > { %v813_v17 = vpop.f32.mrf.mxu0  ;;  %v854_v20 = vpop.f32.mrf.mxu1 }
 0x15a   : > { %v814_v19 = vadd.f32 %v813_v17, %v422_v14  ;;  %v855_v21 = vadd.f32 %v854_v20, %v430_v15  ;;  %v4099_v15 = vld [vmem:[#allocation8 + $0x640] ss:$16 sps:$4 sm:$0xff]   ;;  %v4107_v17 = vld [vmem:[#allocation8 + $0x624] ss:$16 sps:$4 sm:$0xff]  }
 0x15b   : > { %v815_v22 = vpop.f32.mrf.mxu0  ;;  %v856_v23 = vpop.f32.mrf.mxu1  ;;  %v4110_v20 = vld [vmem:[#allocation8 + $0x404] ss:$16 sps:$4 sm:$0xff]  }
 0x15c   : > { %4450 = vtanh.f32 %v814_v19  ;;  %v816_v12 = vadd.f32 %v815_v22, %v426_v16  ;;  %v857_v24 = vadd.f32 %v856_v23, %v434_v18  ;;  %v4104_v16 = vld [vmem:[#allocation8 + $0x424] ss:$16 sps:$4 sm:$0xff]   ;;  %v4102_v18 = vld [vmem:[#allocation8 + $0x420] ss:$16 sps:$4 sm:$0xff]  }
 0x15d   : > { %4452 = vtanh.f32 %v855_v21  ;;  %v817_v25 = vpop.f32.mrf.mxu0  ;;  %v858_v26 = vpop.f32.mrf.mxu1  ;;  %v4105_v19 = vld [vmem:[#allocation8 + $0x620] ss:$16 sps:$4 sm:$0xff]   ;;  %v4113_v21 = vld [vmem:[#allocation8 + $0x604] ss:$16 sps:$4 sm:$0xff]  }
 0x15e   : > { %4454 = vtanh.f32 %v816_v12  ;;  %v4108_v22 = vld [vmem:[#allocation8 + $0x400] ss:$16 sps:$4 sm:$0xff]   ;;  %v4116_v23 = vld [vmem:[#allocation8 + $0x5e4] ss:$16 sps:$4 sm:$0xff]  }
 0x15f   : > { %4456 = vtanh.f32 %v857_v24  ;;  %v818_v27 = vpop.f32.mrf.mxu0  ;;  %v859_v28 = vpop.f32.mrf.mxu1  ;;  %v4111_v12 = vld [vmem:[#allocation8 + $0x600] ss:$16 sps:$4 sm:$0xff]   ;;  %v4119_v24 = vld [vmem:[#allocation8 + $0x7e4] ss:$16 sps:$4 sm:$0xff]  }
 0x160   : > { %v4114_v27 = vld [vmem:[#allocation8 + $0x5e0] ss:$16 sps:$4 sm:$0xff]  }
 0x169   : > { %v4451_v29 = vpop.eup %4450 }
 0x16a   : > { %v4453_v30 = vpop.eup %4452  ;;  %v4944_v36 = vpack.c.bf16 %v4451_v29, %v4451_v29  ;;  %v4117_v29 = vld [vmem:[#allocation8 + $0x7e0] ss:$16 sps:$4 sm:$0xff]  }
 0x16b   : > { %v4455_v31 = vpop.eup %4454  ;;  %v4940_v33 = vpack.c.bf16 %v4453_v30, %v4453_v30  ;;  %v4122_v30 = vld [vmem:[#allocation8 + $0x5c4] ss:$16 sps:$4 sm:$0xff]  }
 0x16c   : > { %v4457_v32 = vpop.eup %4456  ;;  %v4942_v34 = vpack.c.bf16 %v4455_v31, %v4455_v31 }
 0x16d   : > { %v4946_v37 = vpack.c.bf16 %v4457_v32, %v4457_v32  ;;  %v4125_v32 = vld [vmem:[#allocation8 + $0x7c4] ss:$16 sps:$4 sm:$0xff]  }
 0x16e   : > { %2549 = vmatprep.mubr.bf16.mxu0 %v4942_v34 }
 0x16f   : > { %2590 = vmatprep.mubr.bf16.mxu1 %v4946_v37  ;;  %2550 = vmatmul.mubr.bf16.vlgmr.msra.gmra.mxu0 %v4944_v36 }
 0x170   : > { %2591 = vmatmul.mubr.bf16.vlgmr.msra.gmra.mxu1 %v4940_v33  ;;  %2600 = vmatpush1.bf16.msra.mxu0 %v4066_v35  ;;  %v4120_v35 = vld [vmem:[#allocation8 + $0x5c0] ss:$16 sps:$4 sm:$0xff]  }
 0x171   : > { %2641 = vmatpush1.bf16.msra.mxu1 %v4069_v38  ;;  %2601 = vmatprep.subr.bf16.mxu0 %v4074_v39  ;;  %v445_v38 = vsub.s32 6, %v4918_v7  ;;  %v4123_v39 = vld [vmem:[#allocation8 + $0x7c0] ss:$16 sps:$4 sm:$0xff]  }
 0x172   : > { %2642 = vmatprep.subr.bf16.mxu1 %v4077_v40  ;;  %v437_v40 = vsub.s32 4, %v4918_v7 }
 0x174   : > { %2602 = vmatpush1.bf16.msra.mxu0 %v4072_v41  ;;  %v4128_v41 = vld [vmem:[#allocation8 + $0x5a4] ss:$16 sps:$4 sm:$0xff]  }
 0x175   : > { %2643 = vmatpush1.bf16.msra.mxu1 %v4075_v0  ;;  %2603 = vmatprep.subr.bf16.mxu0 %v4080_v42  ;;  %v4131_v0 = vld [vmem:[#allocation8 + $0x7a4] ss:$16 sps:$4 sm:$0xff]   ;;  %v446_v42 = vrot.slane %v4923_v9, %v445_v38  ;;  %v4194_v38 = vld [vmem:[#allocation8 + $0x4c] ss:$16 sps:$4 sm:$0xff]  }
 0x176   : > { %2644 = vmatprep.subr.bf16.mxu1 %v4083_v43  ;;  %v4126_v43 = vld [vmem:[#allocation8 + $0x5a0] ss:$16 sps:$4 sm:$0xff]  }
 0x178   : > { %2604 = vmatpush1.bf16.msra.mxu0 %v4078_v44  ;;  %v438_v44 = vrot.slane %v4923_v9, %v437_v40  ;;  %v4138_v9 = vld [vmem:[#allocation8 + $0x560] ss:$16 sps:$4 sm:$0xff]   ;;  %v4192_v40 = vld [vmem:[#allocation8 + $0x48] ss:$16 sps:$4 sm:$0xff]  }
 0x179   : > { %2645 = vmatpush1.bf16.msra.mxu1 %v4081_v46  ;;  %2605 = vmatprep.subr.bf16.mxu0 %v4086_v47  ;;  %v4955_v54 = vpop.f32.mrf.mxu0  ;;  %v4958_v57 = vpop.f32.mrf.mxu1  ;;  %v4134_v46 = vld [vmem:[#allocation8 + $0x584] ss:$16 sps:$4 sm:$0xff]  }
 0x17a   : > { %2646 = vmatprep.subr.bf16.mxu1 %v4089_v49  ;;  %v4137_v47 = vld [vmem:[#allocation8 + $0x784] ss:$16 sps:$4 sm:$0xff]   ;;  %v937_v48 = vadd.f32 %v4958_v57, %v446_v42  ;;  %v4132_v49 = vld [vmem:[#allocation8 + $0x580] ss:$16 sps:$4 sm:$0xff]   ;;  %v4203_v42 = vld [vmem:[#allocation8 + $0x22c] ss:$16 sps:$4 sm:$0xff]  }
 0x17b   : > { %v897_v58 = vpop.f32.mrf.mxu0  ;;  %v938_v61 = vpop.f32.mrf.mxu1  ;;  %v4149_v57 = vld [vmem:[#allocation8 + $0x744] ss:$16 sps:$4 sm:$0xff]  }
 0x17c   : > { %2606 = vmatpush1.bf16.msra.mxu0 %v4084_v50  ;;  %v898_v60 = vadd.f32 %v897_v58, %v442_v51  ;;  %v939_v2 = vadd.f32 %v938_v61, %v450_v55  ;;  %v896_v50 = vadd.f32 %v4955_v54, %v438_v44  ;;  %v4135_v51 = vld [vmem:[#allocation8 + $0x780] ss:$16 sps:$4 sm:$0xff]   ;;  %v4201_v44 = vld [vmem:[#allocation8 + $0x228] ss:$16 sps:$4 sm:$0xff]  }
 0x17d   : > { %2647 = vmatpush1.bf16.msra.mxu1 %v4087_v52  ;;  %2607 = vmatprep.subr.bf16.mxu0 %v4092_v53  ;;  %v899_v1 = vpop.f32.mrf.mxu0  ;;  %v940_v4 = vpop.f32.mrf.mxu1  ;;  %v4140_v52 = vld [vmem:[#allocation8 + $0x564] ss:$16 sps:$4 sm:$0xff]   ;;  %v4141_v55 = vld [vmem:[#allocation8 + $0x760] ss:$16 sps:$4 sm:$0xff]  }
 0x17e   : > { %2648 = vmatprep.subr.bf16.mxu1 %v4095_v56  ;;  %4458 = vtanh.f32 %v898_v60  ;;  %v4143_v53 = vld [vmem:[#allocation8 + $0x764] ss:$16 sps:$4 sm:$0xff]   ;;  %v4144_v58 = vld [vmem:[#allocation8 + $0x540] ss:$16 sps:$4 sm:$0xff]  }
 0x17f   : > { %4460 = vtanh.f32 %v939_v2  ;;  %v900_v5 = vpop.f32.mrf.mxu0  ;;  %v941_v14 = vpop.f32.mrf.mxu1  ;;  %v4146_v56 = vld [vmem:[#allocation8 + $0x544] ss:$16 sps:$4 sm:$0xff]   ;;  %v4147_v54 = vld [vmem:[#allocation8 + $0x740] ss:$16 sps:$4 sm:$0xff]  }
 0x180   : > { %2608 = vmatpush1.bf16.msra.mxu0 %v4090_v59  ;;  %4462 = vtanh.f32 %v937_v48  ;;  %v4152_v59 = vld [vmem:[#allocation8 + $0x524] ss:$16 sps:$4 sm:$0xff]   ;;  %v4150_v61 = vld [vmem:[#allocation8 + $0x520] ss:$16 sps:$4 sm:$0xff]   ;;  %v4164_v5 = vld [vmem:[#allocation8 + $0xec] ss:$16 sps:$4 sm:$0xff]  }
 0x181   : > { %2649 = vmatpush1.bf16.msra.mxu1 %v4093_v62  ;;  %2609 = vmatprep.subr.bf16.mxu0 %v4098_v63  ;;  %4464 = vtanh.f32 %v896_v50  ;;  %v4155_v60 = vld [vmem:[#allocation8 + $0x724] ss:$16 sps:$4 sm:$0xff]   ;;  %v4153_v62 = vld [vmem:[#allocation8 + $0x720] ss:$16 sps:$4 sm:$0xff]   ;;  %v4167_v14 = vld [vmem:[#allocation8 + $0x2ec] ss:$16 sps:$4 sm:$0xff]  }
 0x182   : > { %2650 = vmatprep.subr.bf16.mxu1 %v4101_v3  ;;  %v4158_v63 = vld [vmem:[#allocation8 + $0x504] ss:$16 sps:$4 sm:$0xff]   ;;  %v4156_v2 = vld [vmem:[#allocation8 + $0x500] ss:$16 sps:$4 sm:$0xff]   ;;  %v4207_v48 = vld [vmem:[#allocation8 + $0x208] ss:$16 sps:$4 sm:$0xff]  }
 0x183   : > { %v4161_v1 = vld [vmem:[#allocation8 + $0x704] ss:$16 sps:$4 sm:$0xff]   ;;  %v4159_v4 = vld [vmem:[#allocation8 + $0x700] ss:$16 sps:$4 sm:$0xff]   ;;  %v4215_v50 = vld [vmem:[#allocation8 + $0x3ec] ss:$16 sps:$4 sm:$0xff]  }
 0x184   : > { %2610 = vmatpush1.bf16.msra.mxu0 %v4096_v6 }
 0x185   : > { %2651 = vmatpush1.bf16.msra.mxu1 %v4099_v15  ;;  %2611 = vmatprep.subr.bf16.mxu0 %v4104_v16  ;;  %v4162_v16 = vld [vmem:[#allocation8 + $0xe8] ss:$16 sps:$4 sm:$0xff]  }
 0x186   : > { %2652 = vmatprep.subr.bf16.mxu1 %v4107_v17 }
 0x188   : > { %2612 = vmatpush1.bf16.msra.mxu0 %v4102_v18  ;;  %v4165_v18 = vld [vmem:[#allocation8 + $0x2e8] ss:$16 sps:$4 sm:$0xff]  }
 0x189   : > { %2653 = vmatpush1.bf16.msra.mxu1 %v4105_v19  ;;  %2613 = vmatprep.subr.bf16.mxu0 %v4110_v20  ;;  %v4170_v19 = vld [vmem:[#allocation8 + $0xcc] ss:$16 sps:$4 sm:$0xff]  }
 0x18a   : > { %2654 = vmatprep.subr.bf16.mxu1 %v4113_v21  ;;  %v4173_v20 = vld [vmem:[#allocation8 + $0x2cc] ss:$16 sps:$4 sm:$0xff]   ;;  %v4168_v21 = vld [vmem:[#allocation8 + $0xc8] ss:$16 sps:$4 sm:$0xff]  }
 0x18b   : > { %v4459_v25 = vpop.eup %4458 }
 0x18c   : > { %v4461_v26 = vpop.eup %4460  ;;  %2614 = vmatpush1.bf16.msra.mxu0 %v4108_v22  ;;  %v4960_v28 = vpack.c.bf16 %v4459_v25, %v4459_v25  ;;  %v4171_v22 = vld [vmem:[#allocation8 + $0x2c8] ss:$16 sps:$4 sm:$0xff]  }
 0x18d   : > { %2655 = vmatpush1.bf16.msra.mxu1 %v4111_v12  ;;  %2615 = vmatprep.subr.bf16.mxu0 %v4116_v23  ;;  %v4962_v31 = vpack.c.bf16 %v4461_v26, %v4461_v26  ;;  %v4463_v3 = vpop.eup %4462  ;;  %v4176_v12 = vld [vmem:[#allocation8 + $0xac] ss:$16 sps:$4 sm:$0xff]   ;;  %v4177_v25 = vld [vmem:[#allocation8 + $0x2a8] ss:$16 sps:$4 sm:$0xff]  }
 0x18e   : > { %2656 = vmatprep.subr.bf16.mxu1 %v4119_v24  ;;  %2631 = vmatprep.mubr.bf16.mxu0 %v4960_v28  ;;  %v4465_v6 = vpop.eup %4464  ;;  %v4972_v15 = vpack.c.bf16 %v4463_v3, %v4463_v3  ;;  %v4179_v23 = vld [vmem:[#allocation8 + $0x2ac] ss:$16 sps:$4 sm:$0xff]   ;;  %v4174_v24 = vld [vmem:[#allocation8 + $0xa8] ss:$16 sps:$4 sm:$0xff]  }
 0x18f   : > { %2672 = vmatprep.mubr.bf16.mxu1 %v4962_v31  ;;  %v4974_v17 = vpack.c.bf16 %v4465_v6, %v4465_v6  ;;  %v4182_v26 = vld [vmem:[#allocation8 + $0x8c] ss:$16 sps:$4 sm:$0xff]   ;;  %v4234_v3 = vld [vmem:[#allocation8 + $0x168] ss:$16 sps:$4 sm:$0xff]  }
 0x190   : > { %2616 = vmatpush2.bf16.msra.mxu0 %v4114_v27  ;;  %v4185_v27 = vld [vmem:[#allocation8 + $0x28c] ss:$16 sps:$4 sm:$0xff]  }
 0x191   : > { %2657 = vmatpush2.bf16.msra.mxu1 %v4117_v29  ;;  %2617 = vmatprep.subr.bf16.mxu0 %v4122_v30  ;;  %v4180_v29 = vld [vmem:[#allocation8 + $0x88] ss:$16 sps:$4 sm:$0xff]   ;;  %v4188_v30 = vld [vmem:[#allocation8 + $0x6c] ss:$16 sps:$4 sm:$0xff]  }
 0x192   : > { %2658 = vmatprep.subr.bf16.mxu1 %v4125_v32  ;;  %v4191_v32 = vld [vmem:[#allocation8 + $0x26c] ss:$16 sps:$4 sm:$0xff]  }
 0x193   : > { %v4245_v6 = vld [vmem:[#allocation8 + $0x34c] ss:$16 sps:$4 sm:$0xff]  }
 0x194   : > { %2618 = vmatpush2.bf16.msra.mxu0 %v4120_v35  ;;  %v4189_v35 = vld [vmem:[#allocation8 + $0x268] ss:$16 sps:$4 sm:$0xff]  }
 0x195   : > { %2659 = vmatpush2.bf16.msra.mxu1 %v4123_v39  ;;  %2619 = vmatprep.subr.bf16.mxu0 %v4128_v41  ;;  %v4197_v39 = vld [vmem:[#allocation8 + $0x24c] ss:$16 sps:$4 sm:$0xff]   ;;  %v4195_v41 = vld [vmem:[#allocation8 + $0x248] ss:$16 sps:$4 sm:$0xff]  }
 0x196   : > { %2660 = vmatprep.subr.bf16.mxu1 %v4131_v0  ;;  %v4200_v0 = vld [vmem:[#allocation8 + $0x2c] ss:$16 sps:$4 sm:$0xff]  }
 0x198   : > { %2620 = vmatpush2.bf16.msra.mxu0 %v4126_v43  ;;  %v4198_v43 = vld [vmem:[#allocation8 + $0x28] ss:$16 sps:$4 sm:$0xff]  }
 0x199   : > { %2661 = vmatpush2.bf16.msra.mxu1 %v4129_v45  ;;  %2621 = vmatprep.subr.bf16.mxu0 %v4134_v46  ;;  %v4206_v45 = vld [vmem:[#allocation8 + $0xc] ss:$16 sps:$4 sm:$0xff]  }
 0x19a   : > { %2662 = vmatprep.subr.bf16.mxu1 %v4137_v47  ;;  %v4209_v46 = vld [vmem:[#allocation8 + $0x20c] ss:$16 sps:$4 sm:$0xff]   ;;  %v4204_v47 = vld [vmem:[#allocation8 + $0x8] ss:$16 sps:$4 sm:$0xff]  }
 0x19c   : > { %2622 = vmatpush2.bf16.msra.mxu0 %v4132_v49  ;;  %v4212_v49 = vld [vmem:[#allocation8 + $0x1ec] ss:$16 sps:$4 sm:$0xff]  }
 0x19d   : > { %2663 = vmatpush2.bf16.msra.mxu1 %v4135_v51  ;;  %2623 = vmatprep.subr.bf16.mxu0 %v4140_v52  ;;  %v4210_v51 = vld [vmem:[#allocation8 + $0x1e8] ss:$16 sps:$4 sm:$0xff]  }
 0x19e   : > { %2664 = vmatprep.subr.bf16.mxu1 %v4143_v53  ;;  %v4213_v52 = vld [vmem:[#allocation8 + $0x3e8] ss:$16 sps:$4 sm:$0xff]   ;;  %v4218_v53 = vld [vmem:[#allocation8 + $0x1cc] ss:$16 sps:$4 sm:$0xff]  }
 0x1a0   : > { %2624 = vmatpush2.bf16.msra.mxu0 %v4138_v9  ;;  %v4221_v9 = vld [vmem:[#allocation8 + $0x3cc] ss:$16 sps:$4 sm:$0xff]  }
 0x1a1   : > { %2665 = vmatpush2.bf16.msra.mxu1 %v4141_v55  ;;  %2625 = vmatprep.subr.bf16.mxu0 %v4146_v56  ;;  %v4216_v55 = vld [vmem:[#allocation8 + $0x1c8] ss:$16 sps:$4 sm:$0xff]  }
 0x1a2   : > { %2666 = vmatprep.subr.bf16.mxu1 %v4149_v57  ;;  %v4219_v56 = vld [vmem:[#allocation8 + $0x3c8] ss:$16 sps:$4 sm:$0xff]   ;;  %v4224_v57 = vld [vmem:[#allocation8 + $0x1ac] ss:$16 sps:$4 sm:$0xff]  }
 0x1a4   : > { %2626 = vmatpush2.bf16.msra.mxu0 %v4144_v58  ;;  %v4227_v58 = vld [vmem:[#allocation8 + $0x3ac] ss:$16 sps:$4 sm:$0xff]  }
 0x1a5   : > { %2667 = vmatpush2.bf16.msra.mxu1 %v4147_v54  ;;  %2627 = vmatprep.subr.bf16.mxu0 %v4152_v59  ;;  %v4222_v54 = vld [vmem:[#allocation8 + $0x1a8] ss:$16 sps:$4 sm:$0xff]  }
 0x1a6   : > { %2668 = vmatprep.subr.bf16.mxu1 %v4155_v60  ;;  %v4225_v59 = vld [vmem:[#allocation8 + $0x3a8] ss:$16 sps:$4 sm:$0xff]   ;;  %v4230_v60 = vld [vmem:[#allocation8 + $0x18c] ss:$16 sps:$4 sm:$0xff]  }
 0x1a8   : > { %2628 = vmatpush2.bf16.msra.mxu0 %v4150_v61  ;;  %v4233_v61 = vld [vmem:[#allocation8 + $0x38c] ss:$16 sps:$4 sm:$0xff]  }
 0x1a9   : > { %2669 = vmatpush2.bf16.msra.mxu1 %v4153_v62  ;;  %2629 = vmatprep.subr.bf16.mxu0 %v4158_v63  ;;  %v4228_v62 = vld [vmem:[#allocation8 + $0x188] ss:$16 sps:$4 sm:$0xff]  }
 0x1aa   : > { %2670 = vmatprep.subr.bf16.mxu1 %v4161_v1  ;;  %v4231_v63 = vld [vmem:[#allocation8 + $0x388] ss:$16 sps:$4 sm:$0xff]   ;;  %v4236_v1 = vld [vmem:[#allocation8 + $0x16c] ss:$16 sps:$4 sm:$0xff]  }
 0x1ac   : > { %2630 = vmatpush2.bf16.msra.mxu0 %v4156_v2  ;;  %v4239_v2 = vld [vmem:[#allocation8 + $0x36c] ss:$16 sps:$4 sm:$0xff]  }
 0x1ad   : > { %2671 = vmatpush2.bf16.msra.mxu1 %v4159_v4  ;;  %2681 = vmatprep.subr.bf16.mxu0 %v4164_v5  ;;  %v4237_v4 = vld [vmem:[#allocation8 + $0x368] ss:$16 sps:$4 sm:$0xff]   ;;  %v4242_v5 = vld [vmem:[#allocation8 + $0x14c] ss:$16 sps:$4 sm:$0xff]  }
 0x1ae   : > { %2722 = vmatprep.subr.bf16.mxu1 %v4167_v14  ;;  %v4240_v14 = vld [vmem:[#allocation8 + $0x148] ss:$16 sps:$4 sm:$0xff]  }
 0x1af   : > { %2632 = vmatmul.mubr.bf16.vlgmr.msra.gmra.mxu0 %v4974_v17 }
 0x1b0   : > { %2673 = vmatmul.mubr.bf16.vlgmr.msra.gmra.mxu1 %v4972_v15  ;;  %2682 = vmatpush1.bf16.msra.mxu0 %v4162_v16  ;;  %v4243_v16 = vld [vmem:[#allocation8 + $0x348] ss:$16 sps:$4 sm:$0xff]  }
 0x1b1   : > { %2713 = vmatprep.mubr.bf16.mxu0 %v4942_v34  ;;  %2723 = vmatpush1.bf16.msra.mxu1 %v4165_v18  ;;  %v4183_v34 = vld [vmem:[#allocation8 + $0x288] ss:$16 sps:$4 sm:$0xff]   ;;  %v4248_v18 = vld [vmem:[#allocation8 + $0x12c] ss:$16 sps:$4 sm:$0xff]  }
 0x1b2   : > { %2754 = vmatprep.mubr.bf16.mxu1 %v4946_v37  ;;  %2683 = vmatprep.subr.bf16.mxu0 %v4170_v19  ;;  %v4186_v37 = vld [vmem:[#allocation8 + $0x68] ss:$16 sps:$4 sm:$0xff]   ;;  %v4251_v19 = vld [vmem:[#allocation8 + $0x32c] ss:$16 sps:$4 sm:$0xff]  }
 0x1b3   : > { %2724 = vmatprep.subr.bf16.mxu1 %v4173_v20  ;;  %v4246_v20 = vld [vmem:[#allocation8 + $0x128] ss:$16 sps:$4 sm:$0xff]  }
 0x1b4   : > { %2684 = vmatpush1.bf16.msra.mxu0 %v4168_v21  ;;  %v4249_v21 = vld [vmem:[#allocation8 + $0x328] ss:$16 sps:$4 sm:$0xff]  }
 0x1b5   : > { %2725 = vmatpush1.bf16.msra.mxu1 %v4171_v22  ;;  %2685 = vmatprep.subr.bf16.mxu0 %v4176_v12  ;;  %v4254_v22 = vld [vmem:[#allocation8 + $0x10c] ss:$16 sps:$4 sm:$0xff]  }
 0x1b6   : > { %2726 = vmatprep.subr.bf16.mxu1 %v4179_v23  ;;  %v4257_v12 = vld [vmem:[#allocation8 + $0x30c] ss:$16 sps:$4 sm:$0xff]   ;;  %v4252_v23 = vld [vmem:[#allocation8 + $0x108] ss:$16 sps:$4 sm:$0xff]  }
 0x1b8   : > { %2686 = vmatpush1.bf16.msra.mxu0 %v4174_v24  ;;  %v4255_v24 = vld [vmem:[#allocation8 + $0x308] ss:$16 sps:$4 sm:$0xff]  }
 0x1b9   : > { %2727 = vmatpush1.bf16.msra.mxu1 %v4177_v25  ;;  %2687 = vmatprep.subr.bf16.mxu0 %v4182_v26  ;;  %v4260_v25 = vld [vmem:[#allocation8 + $0x4ec] ss:$16 sps:$4 sm:$0xff]  }
 0x1ba   : > { %2728 = vmatprep.subr.bf16.mxu1 %v4185_v27  ;;  %v4263_v26 = vld [vmem:[#allocation8 + $0x6ec] ss:$16 sps:$4 sm:$0xff]   ;;  %v4258_v27 = vld [vmem:[#allocation8 + $0x4e8] ss:$16 sps:$4 sm:$0xff]  }
 0x1bc   : > { %2688 = vmatpush1.bf16.msra.mxu0 %v4180_v29  ;;  %v4261_v29 = vld [vmem:[#allocation8 + $0x6e8] ss:$16 sps:$4 sm:$0xff]  }
 0x1bd   : > { %2729 = vmatpush1.bf16.msra.mxu1 %v4183_v34  ;;  %2689 = vmatprep.subr.bf16.mxu0 %v4188_v30  ;;  %v4266_v34 = vld [vmem:[#allocation8 + $0x4cc] ss:$16 sps:$4 sm:$0xff]  }
 0x1be   : > { %2730 = vmatprep.subr.bf16.mxu1 %v4191_v32  ;;  %v4269_v30 = vld [vmem:[#allocation8 + $0x6cc] ss:$16 sps:$4 sm:$0xff]   ;;  %v4264_v32 = vld [vmem:[#allocation8 + $0x4c8] ss:$16 sps:$4 sm:$0xff]  }
 0x1c0   : > { %2690 = vmatpush1.bf16.msra.mxu0 %v4186_v37  ;;  %v4267_v37 = vld [vmem:[#allocation8 + $0x6c8] ss:$16 sps:$4 sm:$0xff]  }
 0x1c1   : > { %2731 = vmatpush1.bf16.msra.mxu1 %v4189_v35  ;;  %2691 = vmatprep.subr.bf16.mxu0 %v4194_v38  ;;  %v4272_v35 = vld [vmem:[#allocation8 + $0x4ac] ss:$16 sps:$4 sm:$0xff]  }
 0x1c2   : > { %2732 = vmatprep.subr.bf16.mxu1 %v4197_v39  ;;  %v4275_v38 = vld [vmem:[#allocation8 + $0x6ac] ss:$16 sps:$4 sm:$0xff]   ;;  %v4270_v39 = vld [vmem:[#allocation8 + $0x4a8] ss:$16 sps:$4 sm:$0xff]  }
 0x1c4   : > { %2692 = vmatpush1.bf16.msra.mxu0 %v4192_v40  ;;  %v4278_v40 = vld [vmem:[#allocation8 + $0x48c] ss:$16 sps:$4 sm:$0xff]  }
 0x1c5   : > { %2733 = vmatpush1.bf16.msra.mxu1 %v4195_v41  ;;  %2693 = vmatprep.subr.bf16.mxu0 %v4200_v0  ;;  %v4276_v41 = vld [vmem:[#allocation8 + $0x488] ss:$16 sps:$4 sm:$0xff]   ;;  %v4284_v0 = vld [vmem:[#allocation8 + $0x46c] ss:$16 sps:$4 sm:$0xff]  }
 0x1c6   : > { %2734 = vmatprep.subr.bf16.mxu1 %v4203_v42  ;;  %v4287_v42 = vld [vmem:[#allocation8 + $0x66c] ss:$16 sps:$4 sm:$0xff]  }
 0x1c8   : > { %2694 = vmatpush1.bf16.msra.mxu0 %v4198_v43  ;;  %v4285_v43 = vld [vmem:[#allocation8 + $0x668] ss:$16 sps:$4 sm:$0xff]  }
 0x1c9   : > { %2735 = vmatpush1.bf16.msra.mxu1 %v4201_v44  ;;  %2695 = vmatprep.subr.bf16.mxu0 %v4206_v45  ;;  %v4290_v44 = vld [vmem:[#allocation8 + $0x44c] ss:$16 sps:$4 sm:$0xff]  }
 0x1ca   : > { %2736 = vmatprep.subr.bf16.mxu1 %v4209_v46  ;;  %v4293_v45 = vld [vmem:[#allocation8 + $0x64c] ss:$16 sps:$4 sm:$0xff]   ;;  %v4288_v46 = vld [vmem:[#allocation8 + $0x448] ss:$16 sps:$4 sm:$0xff]  }
 0x1cc   : > { %2696 = vmatpush1.bf16.msra.mxu0 %v4204_v47  ;;  %v4291_v47 = vld [vmem:[#allocation8 + $0x648] ss:$16 sps:$4 sm:$0xff]  }
 0x1cd   : > { %2737 = vmatpush1.bf16.msra.mxu1 %v4207_v48  ;;  %2697 = vmatprep.subr.bf16.mxu0 %v4212_v49  ;;  %v4296_v48 = vld [vmem:[#allocation8 + $0x42c] ss:$16 sps:$4 sm:$0xff]  }
 0x1ce   : > { %2738 = vmatprep.subr.bf16.mxu1 %v4215_v50  ;;  %v4299_v49 = vld [vmem:[#allocation8 + $0x62c] ss:$16 sps:$4 sm:$0xff]   ;;  %v4294_v50 = vld [vmem:[#allocation8 + $0x428] ss:$16 sps:$4 sm:$0xff]  }
 0x1d0   : > { %2698 = vmatpush2.bf16.msra.mxu0 %v4210_v51  ;;  %v4297_v51 = vld [vmem:[#allocation8 + $0x628] ss:$16 sps:$4 sm:$0xff]  }
 0x1d1   : > { %2739 = vmatpush2.bf16.msra.mxu1 %v4213_v52  ;;  %2699 = vmatprep.subr.bf16.mxu0 %v4218_v53  ;;  %v4302_v52 = vld [vmem:[#allocation8 + $0x40c] ss:$16 sps:$4 sm:$0xff]  }
 0x1d2   : > { %2740 = vmatprep.subr.bf16.mxu1 %v4221_v9  ;;  %v4305_v53 = vld [vmem:[#allocation8 + $0x60c] ss:$16 sps:$4 sm:$0xff]   ;;  %v4300_v9 = vld [vmem:[#allocation8 + $0x408] ss:$16 sps:$4 sm:$0xff]  }
 0x1d4   : > { %2700 = vmatpush2.bf16.msra.mxu0 %v4216_v55  ;;  %v4303_v55 = vld [vmem:[#allocation8 + $0x608] ss:$16 sps:$4 sm:$0xff]  }
 0x1d5   : > { %2741 = vmatpush2.bf16.msra.mxu1 %v4219_v56  ;;  %2701 = vmatprep.subr.bf16.mxu0 %v4224_v57  ;;  %v4308_v56 = vld [vmem:[#allocation8 + $0x5ec] ss:$16 sps:$4 sm:$0xff]  }
 0x1d6   : > { %2742 = vmatprep.subr.bf16.mxu1 %v4227_v58  ;;  %v4311_v57 = vld [vmem:[#allocation8 + $0x7ec] ss:$16 sps:$4 sm:$0xff]   ;;  %v4306_v58 = vld [vmem:[#allocation8 + $0x5e8] ss:$16 sps:$4 sm:$0xff]  }
 0x1d8   : > { %2702 = vmatpush2.bf16.msra.mxu0 %v4222_v54  ;;  %v4309_v54 = vld [vmem:[#allocation8 + $0x7e8] ss:$16 sps:$4 sm:$0xff]  }
 0x1d9   : > { %2743 = vmatpush2.bf16.msra.mxu1 %v4225_v59  ;;  %2703 = vmatprep.subr.bf16.mxu0 %v4230_v60  ;;  %v4314_v59 = vld [vmem:[#allocation8 + $0x5cc] ss:$16 sps:$4 sm:$0xff]  }
 0x1da   : > { %2744 = vmatprep.subr.bf16.mxu1 %v4233_v61  ;;  %v4317_v60 = vld [vmem:[#allocation8 + $0x7cc] ss:$16 sps:$4 sm:$0xff]   ;;  %v4312_v61 = vld [vmem:[#allocation8 + $0x5c8] ss:$16 sps:$4 sm:$0xff]  }
 0x1dc   : > { %2704 = vmatpush2.bf16.msra.mxu0 %v4228_v62  ;;  %v4315_v62 = vld [vmem:[#allocation8 + $0x7c8] ss:$16 sps:$4 sm:$0xff]  }
 0x1dd   : > { %2745 = vmatpush2.bf16.msra.mxu1 %v4231_v63  ;;  %2705 = vmatprep.subr.bf16.mxu0 %v4236_v1  ;;  %v4320_v63 = vld [vmem:[#allocation8 + $0x5ac] ss:$16 sps:$4 sm:$0xff]  }
 0x1de   : > { %2746 = vmatprep.subr.bf16.mxu1 %v4239_v2  ;;  %v4323_v1 = vld [vmem:[#allocation8 + $0x7ac] ss:$16 sps:$4 sm:$0xff]   ;;  %v4318_v2 = vld [vmem:[#allocation8 + $0x5a8] ss:$16 sps:$4 sm:$0xff]  }
 0x1e0   : > { %2706 = vmatpush2.bf16.msra.mxu0 %v4234_v3  ;;  %v4321_v3 = vld [vmem:[#allocation8 + $0x7a8] ss:$16 sps:$4 sm:$0xff]  }
 0x1e1   : > { %2747 = vmatpush2.bf16.msra.mxu1 %v4237_v4  ;;  %2707 = vmatprep.subr.bf16.mxu0 %v4242_v5  ;;  %v4326_v4 = vld [vmem:[#allocation8 + $0x58c] ss:$16 sps:$4 sm:$0xff]  }
 0x1e2   : > { %2748 = vmatprep.subr.bf16.mxu1 %v4245_v6  ;;  %v4329_v5 = vld [vmem:[#allocation8 + $0x78c] ss:$16 sps:$4 sm:$0xff]   ;;  %v4324_v6 = vld [vmem:[#allocation8 + $0x588] ss:$16 sps:$4 sm:$0xff]  }
 0x1e4   : > { %2708 = vmatpush2.bf16.msra.mxu0 %v4240_v14  ;;  %v4327_v14 = vld [vmem:[#allocation8 + $0x788] ss:$16 sps:$4 sm:$0xff]  }
 0x1e5   : > { %2749 = vmatpush2.bf16.msra.mxu1 %v4243_v16  ;;  %2709 = vmatprep.subr.bf16.mxu0 %v4248_v18  ;;  %v4332_v16 = vld [vmem:[#allocation8 + $0x56c] ss:$16 sps:$4 sm:$0xff]  }
 0x1e6   : > { %2750 = vmatprep.subr.bf16.mxu1 %v4251_v19  ;;  %v4335_v18 = vld [vmem:[#allocation8 + $0x76c] ss:$16 sps:$4 sm:$0xff]   ;;  %v4330_v19 = vld [vmem:[#allocation8 + $0x568] ss:$16 sps:$4 sm:$0xff]  }
 0x1e8   : > { %2710 = vmatpush2.bf16.msra.mxu0 %v4246_v20  ;;  %v4333_v20 = vld [vmem:[#allocation8 + $0x768] ss:$16 sps:$4 sm:$0xff]  }
 0x1e9   : > { %2751 = vmatpush2.bf16.msra.mxu1 %v4249_v21  ;;  %2711 = vmatprep.subr.bf16.mxu0 %v4254_v22  ;;  %v4338_v21 = vld [vmem:[#allocation8 + $0x54c] ss:$16 sps:$4 sm:$0xff]  }
 0x1ea   : > { %2752 = vmatprep.subr.bf16.mxu1 %v4257_v12  ;;  %v4341_v22 = vld [vmem:[#allocation8 + $0x74c] ss:$16 sps:$4 sm:$0xff]   ;;  %v4336_v12 = vld [vmem:[#allocation8 + $0x548] ss:$16 sps:$4 sm:$0xff]  }
 0x1ec   : > { %2712 = vmatpush2.bf16.msra.mxu0 %v4252_v23  ;;  %v4339_v23 = vld [vmem:[#allocation8 + $0x748] ss:$16 sps:$4 sm:$0xff]  }
 0x1ed   : > { %2753 = vmatpush2.bf16.msra.mxu1 %v4255_v24  ;;  %2763 = vmatprep.subr.bf16.mxu0 %v4260_v25  ;;  %v4344_v24 = vld [vmem:[#allocation8 + $0x52c] ss:$16 sps:$4 sm:$0xff]  }
 0x1ee   : > { %2804 = vmatprep.subr.bf16.mxu1 %v4263_v26  ;;  %v4347_v25 = vld [vmem:[#allocation8 + $0x72c] ss:$16 sps:$4 sm:$0xff]   ;;  %v4342_v26 = vld [vmem:[#allocation8 + $0x528] ss:$16 sps:$4 sm:$0xff]  }
 0x1ef   : > { %2714 = vmatmul.mubr.bf16.vlgmr.msra.gmra.mxu0 %v4944_v36  ;;  %v4273_v36 = vld [vmem:[#allocation8 + $0x6a8] ss:$16 sps:$4 sm:$0xff]  }
 0x1f0   : > { %2755 = vmatmul.mubr.bf16.vlgmr.msra.gmra.mxu1 %v4940_v33  ;;  %2764 = vmatpush1.bf16.msra.mxu0 %v4258_v27  ;;  %v4281_v33 = vld [vmem:[#allocation8 + $0x68c] ss:$16 sps:$4 sm:$0xff]   ;;  %v4345_v27 = vld [vmem:[#allocation8 + $0x728] ss:$16 sps:$4 sm:$0xff]  }
 0x1f1   : > { %2795 = vmatprep.mubr.bf16.mxu0 %v4960_v28  ;;  %2805 = vmatpush1.bf16.msra.mxu1 %v4261_v29  ;;  %v4279_v28 = vld [vmem:[#allocation8 + $0x688] ss:$16 sps:$4 sm:$0xff]   ;;  %v4350_v29 = vld [vmem:[#allocation8 + $0x50c] ss:$16 sps:$4 sm:$0xff]  }
 0x1f2   : > { %2836 = vmatprep.mubr.bf16.mxu1 %v4962_v31  ;;  %2765 = vmatprep.subr.bf16.mxu0 %v4266_v34  ;;  %v4282_v31 = vld [vmem:[#allocation8 + $0x468] ss:$16 sps:$4 sm:$0xff]   ;;  %v4353_v34 = vld [vmem:[#allocation8 + $0x70c] ss:$16 sps:$4 sm:$0xff]  }
 0x1f3   : > { %2806 = vmatprep.subr.bf16.mxu1 %v4269_v30  ;;  %v4348_v30 = vld [vmem:[#allocation8 + $0x508] ss:$16 sps:$4 sm:$0xff]  }
 0x1f4   : > { %2766 = vmatpush1.bf16.msra.mxu0 %v4264_v32  ;;  %v4351_v32 = vld [vmem:[#allocation8 + $0x708] ss:$16 sps:$4 sm:$0xff]  }
 0x1f5   : > { %2807 = vmatpush1.bf16.msra.mxu1 %v4267_v37  ;;  %2767 = vmatprep.subr.bf16.mxu0 %v4272_v35  ;;  %v4356_v37 = vld [vmem:[#allocation10 + $0x74] ss:$8 sps:$4 sm:$0xff]   ;;  %v4354_v35 = vld [vmem:[#allocation10 + $0x70] ss:$8 sps:$4 sm:$0xff]  }
 0x1f6   : > { %2808 = vmatprep.subr.bf16.mxu1 %v4275_v38  ;;  %v4359_v38 = vld [vmem:[#allocation10 + $0x64] ss:$8 sps:$4 sm:$0xff]  }
 0x1f8   : > { %2768 = vmatpush1.bf16.msra.mxu0 %v4270_v39 }
 0x1f9   : > { %2809 = vmatpush1.bf16.msra.mxu1 %v4273_v36  ;;  %2769 = vmatprep.subr.bf16.mxu0 %v4278_v40  ;;  %v4357_v40 = vld [vmem:[#allocation10 + $0x60] ss:$8 sps:$4 sm:$0xff]  }
 0x1fa   : > { %2810 = vmatprep.subr.bf16.mxu1 %v4281_v33 }
 0x1fc   : > { %2770 = vmatpush1.bf16.msra.mxu0 %v4276_v41  ;;  %v4362_v41 = vld [vmem:[#allocation10 + $0x54] ss:$8 sps:$4 sm:$0xff]  }
 0x1fd   : > { %2811 = vmatpush1.bf16.msra.mxu1 %v4279_v28  ;;  %2771 = vmatprep.subr.bf16.mxu0 %v4284_v0 }
 0x1fe   : > { %2812 = vmatprep.subr.bf16.mxu1 %v4287_v42 }
 0x200   : > { %2772 = vmatpush1.bf16.msra.mxu0 %v4282_v31  ;;  %v4360_v31 = vld [vmem:[#allocation10 + $0x50] ss:$8 sps:$4 sm:$0xff]  }
 0x201   : > { %2813 = vmatpush1.bf16.msra.mxu1 %v4285_v43  ;;  %2773 = vmatprep.subr.bf16.mxu0 %v4290_v44 }
 0x202   : > { %2814 = vmatprep.subr.bf16.mxu1 %v4293_v45  ;;  %v4402_v45 = vld [vmem:[#allocation10 + $0x170] ss:$8 sps:$4 sm:$0xff]  }
 0x204   : > { %2774 = vmatpush1.bf16.msra.mxu0 %v4288_v46  ;;  %v4407_v46 = vld [vmem:[#allocation10 + $0x164] ss:$8 sps:$4 sm:$0xff]  }
 0x205   : > { %2815 = vmatpush1.bf16.msra.mxu1 %v4291_v47  ;;  %2775 = vmatprep.subr.bf16.mxu0 %v4296_v48  ;;  %v4363_v47 = vld [vmem:[#allocation10 + $0x40] ss:$8 sps:$4 sm:$0xff]   ;;  %v4368_v48 = vld [vmem:[#allocation10 + $0x34] ss:$8 sps:$4 sm:$0xff]  }
 0x206   : > { %2816 = vmatprep.subr.bf16.mxu1 %v4299_v49  ;;  %v4405_v49 = vld [vmem:[#allocation10 + $0x160] ss:$8 sps:$4 sm:$0xff]  }
 0x208   : > { %2776 = vmatpush1.bf16.msra.mxu0 %v4294_v50  ;;  %v4410_v50 = vld [vmem:[#allocation10 + $0x154] ss:$8 sps:$4 sm:$0xff]  }
 0x209   : > { %2817 = vmatpush1.bf16.msra.mxu1 %v4297_v51  ;;  %2777 = vmatprep.subr.bf16.mxu0 %v4302_v52  ;;  %v4366_v51 = vld [vmem:[#allocation10 + $0x30] ss:$8 sps:$4 sm:$0xff]   ;;  %v4371_v52 = vld [vmem:[#allocation10 + $0x24] ss:$8 sps:$4 sm:$0xff]  }
 0x20a   : > { %2818 = vmatprep.subr.bf16.mxu1 %v4305_v53  ;;  %v4408_v53 = vld [vmem:[#allocation10 + $0x150] ss:$8 sps:$4 sm:$0xff]  }
 0x20c   : > { %2778 = vmatpush1.bf16.msra.mxu0 %v4300_v9  ;;  %v4413_v9 = vld [vmem:[#allocation10 + $0x144] ss:$8 sps:$4 sm:$0xff]  }
 0x20d   : > { %2819 = vmatpush1.bf16.msra.mxu1 %v4303_v55  ;;  %2779 = vmatprep.subr.bf16.mxu0 %v4308_v56  ;;  %v4369_v55 = vld [vmem:[#allocation10 + $0x20] ss:$8 sps:$4 sm:$0xff]   ;;  %v4374_v56 = vld [vmem:[#allocation10 + $0x14] ss:$8 sps:$4 sm:$0xff]  }
 0x20e   : > { %2820 = vmatprep.subr.bf16.mxu1 %v4311_v57  ;;  %v4411_v57 = vld [vmem:[#allocation10 + $0x140] ss:$8 sps:$4 sm:$0xff]  }
 0x210   : > { %2780 = vmatpush2.bf16.msra.mxu0 %v4306_v58  ;;  %v4416_v58 = vld [vmem:[#allocation10 + $0x134] ss:$8 sps:$4 sm:$0xff]  }
 0x211   : > { %2821 = vmatpush2.bf16.msra.mxu1 %v4309_v54  ;;  %2781 = vmatprep.subr.bf16.mxu0 %v4314_v59  ;;  %v4372_v54 = vld [vmem:[#allocation10 + $0x10] ss:$8 sps:$4 sm:$0xff]   ;;  %v4377_v59 = vld [vmem:[#allocation10 + $0x4] ss:$8 sps:$4 sm:$0xff]  }
 0x212   : > { %2822 = vmatprep.subr.bf16.mxu1 %v4317_v60  ;;  %v4414_v60 = vld [vmem:[#allocation10 + $0x130] ss:$8 sps:$4 sm:$0xff]  }
 0x214   : > { %2782 = vmatpush2.bf16.msra.mxu0 %v4312_v61  ;;  %v4419_v61 = vld [vmem:[#allocation10 + $0x124] ss:$8 sps:$4 sm:$0xff]  }
 0x215   : > { %2823 = vmatpush2.bf16.msra.mxu1 %v4315_v62  ;;  %2783 = vmatprep.subr.bf16.mxu0 %v4320_v63  ;;  %v4375_v62 = vld [vmem:[#allocation10] ss:$8 sps:$4 sm:$0xff]   ;;  %v4380_v63 = vld [vmem:[#allocation10 + $0xf4] ss:$8 sps:$4 sm:$0xff]  }
 0x216   : > { %2824 = vmatprep.subr.bf16.mxu1 %v4323_v1  ;;  %v4417_v1 = vld [vmem:[#allocation10 + $0x120] ss:$8 sps:$4 sm:$0xff]  }
 0x218   : > { %2784 = vmatpush2.bf16.msra.mxu0 %v4318_v2  ;;  %v4422_v2 = vld [vmem:[#allocation10 + $0x114] ss:$8 sps:$4 sm:$0xff]  }
 0x219   : > { %2825 = vmatpush2.bf16.msra.mxu1 %v4321_v3  ;;  %2785 = vmatprep.subr.bf16.mxu0 %v4326_v4  ;;  %v4378_v3 = vld [vmem:[#allocation10 + $0xf0] ss:$8 sps:$4 sm:$0xff]   ;;  %v4383_v4 = vld [vmem:[#allocation10 + $0xe4] ss:$8 sps:$4 sm:$0xff]  }
 0x21a   : > { %2826 = vmatprep.subr.bf16.mxu1 %v4329_v5  ;;  %v4420_v5 = vld [vmem:[#allocation10 + $0x110] ss:$8 sps:$4 sm:$0xff]  }
 0x21c   : > { %2786 = vmatpush2.bf16.msra.mxu0 %v4324_v6  ;;  %v4425_v6 = vld [vmem:[#allocation10 + $0x104] ss:$8 sps:$4 sm:$0xff]  }
 0x21d   : > { %2827 = vmatpush2.bf16.msra.mxu1 %v4327_v14  ;;  %2787 = vmatprep.subr.bf16.mxu0 %v4332_v16  ;;  %v4381_v14 = vld [vmem:[#allocation10 + $0xe0] ss:$8 sps:$4 sm:$0xff]   ;;  %v4386_v16 = vld [vmem:[#allocation10 + $0xd4] ss:$8 sps:$4 sm:$0xff]  }
 0x21e   : > { %2828 = vmatprep.subr.bf16.mxu1 %v4335_v18  ;;  %v4423_v18 = vld [vmem:[#allocation10 + $0x100] ss:$8 sps:$4 sm:$0xff]  }
 0x220   : > { %2788 = vmatpush2.bf16.msra.mxu0 %v4330_v19  ;;  %v4428_v19 = vld [vmem:[#allocation10 + $0x1f4] ss:$8 sps:$4 sm:$0xff]  }
 0x221   : > { %2829 = vmatpush2.bf16.msra.mxu1 %v4333_v20  ;;  %2789 = vmatprep.subr.bf16.mxu0 %v4338_v21  ;;  %v4384_v20 = vld [vmem:[#allocation10 + $0xd0] ss:$8 sps:$4 sm:$0xff]   ;;  %v4389_v21 = vld [vmem:[#allocation10 + $0xc4] ss:$8 sps:$4 sm:$0xff]  }
 0x222   : > { %2830 = vmatprep.subr.bf16.mxu1 %v4341_v22  ;;  %v4426_v22 = vld [vmem:[#allocation10 + $0x1f0] ss:$8 sps:$4 sm:$0xff]  }
 0x224   : > { %2790 = vmatpush2.bf16.msra.mxu0 %v4336_v12  ;;  %v4431_v12 = vld [vmem:[#allocation10 + $0x1e4] ss:$8 sps:$4 sm:$0xff]  }
 0x225   : > { %2831 = vmatpush2.bf16.msra.mxu1 %v4339_v23  ;;  %2791 = vmatprep.subr.bf16.mxu0 %v4344_v24  ;;  %v4387_v23 = vld [vmem:[#allocation10 + $0xc0] ss:$8 sps:$4 sm:$0xff]   ;;  %v4392_v24 = vld [vmem:[#allocation10 + $0xb4] ss:$8 sps:$4 sm:$0xff]  }
 0x226   : > { %2832 = vmatprep.subr.bf16.mxu1 %v4347_v25  ;;  %v4429_v25 = vld [vmem:[#allocation10 + $0x1e0] ss:$8 sps:$4 sm:$0xff]  }
 0x228   : > { %2792 = vmatpush2.bf16.msra.mxu0 %v4342_v26  ;;  %v4390_v26 = vld [vmem:[#allocation10 + $0xb0] ss:$8 sps:$4 sm:$0xff]  }
 0x229   : > { %2833 = vmatpush2.bf16.msra.mxu1 %v4345_v27  ;;  %2793 = vmatprep.subr.bf16.mxu0 %v4350_v29  ;;  %v4395_v27 = vld [vmem:[#allocation10 + $0xa4] ss:$8 sps:$4 sm:$0xff]   ;;  %v4393_v29 = vld [vmem:[#allocation10 + $0xa0] ss:$8 sps:$4 sm:$0xff]  }
 0x22a   : > { %2834 = vmatprep.subr.bf16.mxu1 %v4353_v34  ;;  %v4398_v34 = vld [vmem:[#allocation10 + $0x94] ss:$8 sps:$4 sm:$0xff]  }
 0x22c   : > { %2794 = vmatpush2.bf16.msra.mxu0 %v4348_v30  ;;  %v4997_v30 = vld [vmem:[%s5064_s4] sm:$0xf] }
 0x22d   : > { %2835 = vmatpush2.bf16.msra.mxu1 %v4351_v32  ;;  %3249 = vmatprep.subr.bf16.mxu0 %v4356_v37  ;;  %v4396_v32 = vld [vmem:[#allocation10 + $0x90] ss:$8 sps:$4 sm:$0xff]   ;;  %v4401_v37 = vld [vmem:[#allocation10 + $0x84] ss:$8 sps:$4 sm:$0xff]  }
 0x22f   : > { %2796 = vmatmul.mubr.bf16.vlgmr.msra.gmra.mxu0 %v4974_v17  ;;  %v4985_v39 = vpop.f32.mrf.mxu0  ;;  %v4365_v17 = vld [vmem:[#allocation10 + $0x44] ss:$8 sps:$4 sm:$0xff]  }
 0x230   : > { %2837 = vmatmul.mubr.bf16.vlgmr.msra.gmra.mxu1 %v4972_v15  ;;  %v4988_v36 = vpop.f32.mrf.mxu1  ;;  %3250 = vmatpush1.bf16.msra.mxu0 %v4354_v35  ;;  %v4404_v15 = vld [vmem:[#allocation10 + $0x174] ss:$8 sps:$4 sm:$0xff]   ;;  %v1220_v35 = vrot.slane %v4997_v30, %v4921_v8 }
 0x231   : > { %v4990_v33 = vpop.f32.mrf.mxu0  ;;  %3251 = vmatprep.subr.bf16.mxu0 %v4359_v38  ;;  %3290 = vmatprep.subr.bf16.mxu1 %v4404_v15  ;;  %v1224_v38 = vrot.slane %v4997_v30, %v4927_v11  ;;  %v4432_v15 = vld [vmem:[#allocation10 + $0x1d0] ss:$8 sps:$4 sm:$0xff]  }
 0x232   : > { %v4992_v28 = vpop.f32.mrf.mxu1  ;;  %3291 = vmatpush1.bf16.msra.mxu1 %v4402_v45 }
 0x233   : > { %v2555_v0 = vpop.f32.mrf.mxu0  ;;  %3292 = vmatprep.subr.bf16.mxu1 %v4407_v46 }
 0x234   : > { %v2596_v42 = vpop.f32.mrf.mxu1  ;;  %3252 = vmatpush1.bf16.msra.mxu0 %v4357_v40  ;;  %v4399_v40 = vld [vmem:[#allocation10 + $0x80] ss:$8 sps:$4 sm:$0xff]   ;;  %v2554_v0 = vadd.f32 %v4990_v33, %v1224_v38 }
 0x235   : > { %v2556_v43 = vpop.f32.mrf.mxu0  ;;  %3253 = vmatprep.subr.bf16.mxu0 %v4362_v41  ;;  %v2552_v41 = vadd.f32 %v4985_v39, %v1220_v35  ;;  %v4437_v39 = vld [vmem:[#allocation10 + $0x1c4] ss:$8 sps:$4 sm:$0xff]  }
 0x236   : > { %v2597_v44 = vpop.f32.mrf.mxu1  ;;  %3293 = vmatpush1.bf16.msra.mxu1 %v4405_v49  ;;  %v4434_v43 = vld [vmem:[#allocation10 + $0x1d4] ss:$8 sps:$4 sm:$0xff]  }
 0x237   : > { %3294 = vmatprep.subr.bf16.mxu1 %v4410_v50  ;;  %v2593_v42 = vadd.f32 %v4988_v36, %v2552_v41 }
 0x238   : > { %3254 = vmatpush1.bf16.msra.mxu0 %v4360_v31 }
 0x239   : > { %3255 = vmatprep.subr.bf16.mxu0 %v4365_v17  ;;  %v2595_v17 = vadd.f32 %v4992_v28, %v2554_v0  ;;  %v4440_v28 = vld [vmem:[#allocation10 + $0x1b4] ss:$8 sps:$4 sm:$0xff]  }
 0x23a   : > { %3295 = vmatpush1.bf16.msra.mxu1 %v4408_v53 }
 0x23b   : > { %3296 = vmatprep.subr.bf16.mxu1 %v4413_v9  ;;  %v4438_v9 = vld [vmem:[#allocation10 + $0x1b0] ss:$8 sps:$4 sm:$0xff]  }
 0x23c   : > { %3256 = vmatpush1.bf16.msra.mxu0 %v4363_v47 }
 0x23d   : > { %3257 = vmatprep.subr.bf16.mxu0 %v4368_v48 }
 0x23e   : > { %3297 = vmatpush1.bf16.msra.mxu1 %v4411_v57  ;;  %v4446_v57 = vld [vmem:[#allocation10 + $0x194] ss:$8 sps:$4 sm:$0xff]  }
 0x23f   : > { %3298 = vmatprep.subr.bf16.mxu1 %v4416_v58  ;;  %v4444_v58 = vld [vmem:[#allocation10 + $0x190] ss:$8 sps:$4 sm:$0xff]  }
 0x240   : > { %3258 = vmatpush1.bf16.msra.mxu0 %v4366_v51 }
 0x241   : > { %3259 = vmatprep.subr.bf16.mxu0 %v4371_v52  ;;  %v4435_v52 = vld [vmem:[#allocation10 + $0x1c0] ss:$8 sps:$4 sm:$0xff]  }
 0x242   : > { %3299 = vmatpush1.bf16.msra.mxu1 %v4414_v60  ;;  %v4449_v60 = vld [vmem:[#allocation10 + $0x184] ss:$8 sps:$4 sm:$0xff]  }
 0x243   : > { %3300 = vmatprep.subr.bf16.mxu1 %v4419_v61 }
 0x244   : > { %3260 = vmatpush1.bf16.msra.mxu0 %v4369_v55  ;;  %v4443_v55 = vld [vmem:[#allocation10 + $0x1a4] ss:$8 sps:$4 sm:$0xff]  }
 0x245   : > { %3261 = vmatprep.subr.bf16.mxu0 %v4374_v56  ;;  %v4441_v56 = vld [vmem:[#allocation10 + $0x1a0] ss:$8 sps:$4 sm:$0xff]  }
 0x246   : > { %3301 = vmatpush1.bf16.msra.mxu1 %v4417_v1 }
 0x247   : > { %3302 = vmatprep.subr.bf16.mxu1 %v4422_v2 }
 0x248   : > { %3262 = vmatpush1.bf16.msra.mxu0 %v4372_v54 }
 0x249   : > { %3263 = vmatprep.subr.bf16.mxu0 %v4377_v59  ;;  %v4447_v59 = vld [vmem:[#allocation10 + $0x180] ss:$8 sps:$4 sm:$0xff]  }
 0x24a   : > { %3303 = vmatpush1.bf16.msra.mxu1 %v4420_v5 }
 0x24b   : > { %3304 = vmatprep.subr.bf16.mxu1 %v4425_v6 }
 0x24c   : > { %3264 = vmatpush1.bf16.msra.mxu0 %v4375_v62 }
 0x24d   : > { %3265 = vmatprep.subr.bf16.mxu0 %v4380_v63 }
 0x24e   : > { %3305 = vmatpush1.bf16.msra.mxu1 %v4423_v18  ;;  %v1228_v18 = vrot.slane %v4997_v30, %v429_v10 }
 0x24f   : > { %3306 = vmatprep.subr.bf16.mxu1 %v4428_v19  ;;  %v1232_v19 = vrot.slane %v4997_v30, %v433_v13 }
 0x250   : > { %3266 = vmatpush2.bf16.msra.mxu0 %v4378_v3 }
 0x251   : > { %3267 = vmatprep.subr.bf16.mxu0 %v4383_v4 }
 0x252   : > { %3307 = vmatpush2.bf16.msra.mxu1 %v4426_v22 }
 0x253   : > { %3308 = vmatprep.subr.bf16.mxu1 %v4431_v12 }
 0x254   : > { %3268 = vmatpush2.bf16.msra.mxu0 %v4381_v14 }
 0x255   : > { %3269 = vmatprep.subr.bf16.mxu0 %v4386_v16 }
 0x256   : > { %3309 = vmatpush2.bf16.msra.mxu1 %v4429_v25 }
 0x257   : > { %3310 = vmatprep.subr.bf16.mxu1 %v4434_v43  ;;  %v2917_v43 = vld [vmem:[%s5066_s6] sm:$0x3] }
 0x258   : > { %3270 = vmatpush2.bf16.msra.mxu0 %v4384_v20 }
 0x259   : > { %3271 = vmatprep.subr.bf16.mxu0 %v4389_v21 }
 0x25a   : > { %3311 = vmatpush2.bf16.msra.mxu1 %v4432_v15 }
 0x25b   : > { %3312 = vmatprep.subr.bf16.mxu1 %v4437_v39 }
 0x25c   : > { %3272 = vmatpush2.bf16.msra.mxu0 %v4387_v23 }
 0x25d   : > { %3273 = vmatprep.subr.bf16.mxu0 %v4392_v24 }
 0x25e   : > { %3313 = vmatpush2.bf16.msra.mxu1 %v4435_v52 }
 0x25f   : > { %3314 = vmatprep.subr.bf16.mxu1 %v4440_v28 }
 0x260   : > { %3274 = vmatpush2.bf16.msra.mxu0 %v4390_v26 }
 0x261   : > { %3275 = vmatprep.subr.bf16.mxu0 %v4395_v27 }
 0x262   : > { %3315 = vmatpush2.bf16.msra.mxu1 %v4438_v9 }
 0x263   : > { %3316 = vmatprep.subr.bf16.mxu1 %v4443_v55 }
 0x264   : > { %3276 = vmatpush2.bf16.msra.mxu0 %v4393_v29 }
 0x265   : > { %3277 = vmatprep.subr.bf16.mxu0 %v4398_v34 }
 0x266   : > { %3317 = vmatpush2.bf16.msra.mxu1 %v4441_v56 }
 0x267   : > { %3318 = vmatprep.subr.bf16.mxu1 %v4446_v57 }
 0x268   : > { %3278 = vmatpush2.bf16.msra.mxu0 %v4396_v32 }
 0x269   : > { %3279 = vmatprep.subr.bf16.mxu0 %v4401_v37 }
 0x26a   : > { %3319 = vmatpush2.bf16.msra.mxu1 %v4444_v58 }
 0x26b   : > { %3320 = vmatprep.subr.bf16.mxu1 %v4449_v60 }
 0x26c   : > { %3280 = vmatpush2.bf16.msra.mxu0 %v4399_v40 }
 0x26e   : > { %3321 = vmatpush2.bf16.msra.mxu1 %v4447_v59 }
 0x26f   : > { %v2633_v31 = vpop.f32.mrf.mxu0 }
 0x270   : > { %v2634_v44 = vadd.f32 %v2633_v31, %v2593_v42  ;;  %v2674_v45 = vpop.f32.mrf.mxu1 }
 0x271   : > { %v2635_v46 = vpop.f32.mrf.mxu0 }
 0x272   : > { %v2675_v47 = vadd.f32 %v2674_v45, %v2634_v44  ;;  %v2636_v48 = vadd.f32 %v2635_v46, %v2595_v17  ;;  %v2676_v49 = vpop.f32.mrf.mxu1  ;;  %v2922_v17 = vrot.slane %v2917_v43, %v4921_v8  ;;  %v2926_v44 = vrot.slane %v2917_v43, %v4927_v11 }
 0x273   : > { %v2637_v50 = vpop.f32.mrf.mxu0 }
 0x274   : > { %v2677_v51 = vadd.f32 %v2676_v49, %v2636_v48  ;;  %v2678_v33 = vpop.f32.mrf.mxu1  ;;  %4466 = vtanh.f32 %v2675_v47 }
 0x275   : > { %v2638_v36 = vpop.f32.mrf.mxu0 }
 0x276   : > { %4468 = vtanh.f32 %v2677_v51  ;;  %v2679_v53 = vpop.f32.mrf.mxu1 }
 0x281   : > { %v4467_v54 = vpop.eup %4466 }
 0x282   : > { %v2849_v63 = vpack.c.bf16 %v4467_v54, %v4467_v54 }
 0x283   : > { %v4469_v61 = vpop.eup %4468 }
 0x284   : > { %v2850_v62 = vpack.c.bf16 %v4469_v61, %v4469_v61 }
 0x286   : > { %3281 = vmatprep.mubr.bf16.mxu0 %v2850_v62 }
 0x287   : > { %3282 = vmatmul.mubr.bf16.vlgmr.msra.gmra.mxu0 %v2849_v63 }
 0x2af   : > { %v2715_v1 = vpop.f32.mrf.mxu0 }
 0x2b0   : > { %v2756_v2 = vpop.f32.mrf.mxu1  ;;  %v2716_v20 = vadd.f32 %v2715_v1, %v1228_v18 }
 0x2b1   : > { %v2717_v3 = vpop.f32.mrf.mxu0 }
 0x2b2   : > { %v2758_v4 = vpop.f32.mrf.mxu1  ;;  %v2718_v21 = vadd.f32 %v2717_v3, %v1232_v19  ;;  %v2757_v22 = vadd.f32 %v2756_v2, %v2716_v20 }
 0x2b3   : > { %v2719_v5 = vpop.f32.mrf.mxu0 }
 0x2b4   : > { %v2760_v6 = vpop.f32.mrf.mxu1  ;;  %v2759_v23 = vadd.f32 %v2758_v4, %v2718_v21 }
 0x2b5   : > { %v2720_v14 = vpop.f32.mrf.mxu0 }
 0x2b6   : > { %v2761_v16 = vpop.f32.mrf.mxu1 }
 0x2ef   : > { %v2797_v12 = vpop.f32.mrf.mxu0 }
 0x2f0   : > { %v2798_v24 = vadd.f32 %v2797_v12, %v2757_v22  ;;  %v2838_v25 = vpop.f32.mrf.mxu1 }
 0x2f1   : > { %v2799_v26 = vpop.f32.mrf.mxu0 }
 0x2f2   : > { %v2839_v27 = vadd.f32 %v2838_v25, %v2798_v24  ;;  %v2800_v29 = vadd.f32 %v2799_v26, %v2759_v23  ;;  %v2840_v34 = vpop.f32.mrf.mxu1 }
 0x2f3   : > { %v2801_v32 = vpop.f32.mrf.mxu0 }
 0x2f4   : > { %v2841_v37 = vadd.f32 %v2840_v34, %v2800_v29  ;;  %v2842_v35 = vpop.f32.mrf.mxu1  ;;  %4470 = vtanh.f32 %v2839_v27 }
 0x2f5   : > { %v2802_v10 = vpop.f32.mrf.mxu0 }
 0x2f6   : > { %4472 = vtanh.f32 %v2841_v37  ;;  %v2843_v7 = vpop.f32.mrf.mxu1 }
 0x301   : > { %v4471_v38 = vpop.eup %4470 }
 0x302   : > { %v2851_v40 = vpack.c.bf16 %v4471_v38, %v4471_v38 }
 0x303   : > { %v4473_v13 = vpop.eup %4472 }
 0x304   : > { %v2852_v30 = vpack.c.bf16 %v4473_v13, %v4473_v13 }
 0x306   : > { %3322 = vmatprep.mubr.bf16.mxu1 %v2852_v30 }
 0x307   : > { %3323 = vmatmul.mubr.bf16.vlgmr.msra.gmra.mxu1 %v2851_v40 }
 0x347   : > { %v3283_v41 = vpop.f32.mrf.mxu0 }
 0x348   : > { %v3284_v45 = vadd.f32 %v3283_v41, %v2922_v17 }
 0x349   : > { %v3285_v0 = vpop.f32.mrf.mxu0 }
 0x34a   : > { %v3286_v46 = vadd.f32 %v3285_v0, %v2926_v44 }
 0x34b   : > { %v3287_v42 = vpop.f32.mrf.mxu0 }
 0x34d   : > { %v3288_v31 = vpop.f32.mrf.mxu0 }
 0x3c7   : > { %v3324_v15 = vpop.f32.mrf.mxu1 }
 0x3c8   : > { %v3325_v47 = vadd.f32 %v3324_v15, %v3284_v45 }
 0x3c9   : > { %v3326_v48 = vpop.f32.mrf.mxu1 }
 0x3ca   : > { %v3868_v49 = vmul.f32 -1.442695, %v3325_v47  ;;  %v3327_v50 = vadd.f32 %v3326_v48, %v3286_v46 }
 0x3cb   : > { %v3328_v39 = vpop.f32.mrf.mxu1 }
 0x3cc   : > { %4474 = vpow2.f32 %v3868_v49  ;;  %v3869_v51 = vmul.f32 -1.442695, %v3327_v50 }
 0x3cd   : > { %v3329_v33 = vpop.f32.mrf.mxu1 }
 0x3ce   : > { %4476 = vpow2.f32 %v3869_v51 }
 0x3d9   : > { %v4475_v52 = vpop.eup %4474 }
 0x3da   : > { %v3337_v36 = vadd.f32 1.0, %v4475_v52 }
 0x3db   : > { %v4477_v8 = vpop.eup %4476 }
 0x3dc   : > { %4478 = vrcp.f32 %v3337_v36  ;;  %v3338_v11 = vadd.f32 1.0, %v4477_v8 }
 0x3de   : > { %4480 = vrcp.f32 %v3338_v11 }
 0x3e9   : > { %v4479_v53 = vpop.eup %4478 }
 0x3ea   : > { %3343 = vst [vmem:[%s349_s20] sm:$0xff] %v4479_v53 }
 0x3eb   : > { %v4481_v28 = vpop.eup %4480 }
 0x3ec   : > { %3344 = vst [vmem:[%s349_s20 + $0x8] sm:$0xff] %v4481_v28 }
 0x3ed   : > { %4627 = shalt.err (!%p4624_p11)
}
 0x3ee   : > { %s4628_s2 = scalar_lea.hbm %s5023_s11, 256  ;;  %s4632_s23 = scalar_lea.hbm %s5067_s7, 512 }
 0x3ef   : > { %p4629_p13 = scmp.ne.s32.totalorder %s5023_s11, %s4628_s2  ;;  %p4633_p4 = scmp.lt.s32.totalorder %s5023_s11, %s5067_s7 }
 0x3f0   : > { %p4634_p6 = scmp.lt.s32.totalorder %s4632_s23, %s4628_s2 }
 0x3f1   : > { %p4630_p1 = pnand %p4629_p13, %p5089_p7 }
 0x3f2   : > { %p4635_p2 = por %p4634_p6, %p4633_p4 }
 0x3f3   : > { %p4631_p3 = pneg %p4630_p1 }
 0x3f5   : > { %p4636_p8 = pnand %p4635_p2, %p4631_p3 }
 0x3f7   : > { %4639 = shalt.err (!%p4636_p8)
}
 0x3f8   : > { %3894 = dma.vmem_to_hbm [thread:$0]  (%p5089_p7), %s3361_s15, 256, %s5023_s11, %s3346_s28  }
 0x3f9 PF: > { %s3372_s18 = sand.u32 1, %s4674_s24   ;;  %p5090_p10 = scmp.ne.s32.totalorder %s5081_s9, 0 }
 0x3fa   : > { %p5091_p0 = scmp.ge.s32.totalorder %s4686_s27, 2  ;;  %s3373_s20 = scalar_lea.sflag [#allocation4], %s3372_s18 }
 0x3fc   : > { %p3914_p12 = pnand %p5091_p0, %p5090_p10 }
 0x3fe   : > { %p3915_p5 = pneg %p3914_p12 }
 0x400   : > { %4669 = dma.done.wait (%p3915_p5), %s3373_s20, 256  }
 0x401   : > { %4671 = vsyncadd (%p3915_p5), %s3373_s20, 4294967040  ;;  %p22_p9 = scmp.ge.s32.totalorder %s4826_s19, 4   ;;  %s5092_s24 = smov %s4678_s25 }
 0x402   : > { %s5093_s25 = smov %s4682_s26  ;;  %s5094_s26 = smov %s4837_s22 }
 0x403   : > { %s5095_s27 = smov %s4826_s19  ;;  %24 = sbr.rel (!%p22_p9) target bundleno = 10 (0xa), region = 109 }
 0x408   :  { %3378 = vsyncpa [#allocation3], 1 }
 0x409   :  { %3380 = vsyncpa [#allocation3 + $0x1], 1 }
 0x40a   :  { %3381 = vsyncpa [#allocation6], 1 }
 0x40b   :  { %3382 = vsyncpa [#allocation9], 1 }
 0x40c   :  { %3383 = vsyncpa [#allocation4], 1 }
 0x40d   :  { %3385 = vsyncpa [#allocation4 + $0x1], 1 }

</bundles_post_ra>
